<compile_context>
chip_gen: v6e
topology: v6e:2x2x1
jax: 0.10.0
libtpu: 0.0.40
codegen_flags: <defaults>
</compile_context>

<pallas_src>
import functools
import numpy as np
import jax
import jax.numpy as jnp
from jax.experimental import pallas as pl
from jax.experimental.pallas import tpu as pltpu

ALIGN = 8            # AdaptiveAvgPool2d output spatial size
SP = ALIGN * ALIGN   # 64 spatial positions
HIDDEN1 = 100
HIDDEN2 = 10
H1_PAD = 128         # 100 padded to full lane width
H2_PAD = 16
BN_EPS = 1e-5


# ----------------------------- fused Pallas kernel --------------------------

def _fused_classifier_kernel(x_ref, pool_ref, w1_ref, s1_ref, b1_ref,
                             w2_ref, s2_ref, b2_ref, wsp_ref, fb1_ref,
                             fw2_ref, fb2_ref, o_ref, *, group):
    bt, cin, hw = x_ref.shape
    G = group
    n_groups = bt // G

    # ---- hoisted loop-invariant reads (review #4) ----
    s1 = s1_ref[...]
    b1 = b1_ref[...]
    w2 = w2_ref[...]
    s2 = s2_ref[...]
    b2 = b2_ref[...]
    wsp = wsp_ref[...]
    fb1 = fb1_ref[...]
    fw2 = fw2_ref[...]
    fb2 = fb2_ref[...]
    w1_taps = [w1_ref[t] for t in range(9)]           # 9 x (128, Cin) bf16

    # ---- AdaptiveAvgPool2d(8,8) + zero pad + 9 conv taps folded into ONE matmul
    #      for the whole batch tile (review #1); in-kernel bf16 cast (review #9).
    xb = x_ref[...].astype(jnp.bfloat16).reshape(bt * cin, hw)
    pooled = jnp.dot(xb, pool_ref[...], preferred_element_type=jnp.float32)
    pooled = pooled.astype(jnp.bfloat16)               # (bt*Cin, 9*64)

    fc1_rows = []
    for gi in range(n_groups):
        # ---- conv1 (3x3, pad=1) + folded BN + ReLU.  G images packed along lanes
        #      (N = G*64), 9 accumulating per-tap dots instead of a sublane concat
        #      (review #2 / #3).
        acc = None
        for t in range(9):
            if G == 1:
                rhs = pooled[gi * cin:(gi + 1) * cin, t * SP:(t + 1) * SP]
            else:
                rhs = jnp.concatenate(
                    [pooled[(gi * G + g) * cin:(gi * G + g + 1) * cin,
                            t * SP:(t + 1) * SP] for g in range(G)], axis=1)
            d = jnp.dot(w1_taps[t], rhs, preferred_element_type=jnp.float32)
            acc = d if acc is None else acc + d
        h1 = jnp.maximum(acc * s1 + b1, 0.0).astype(jnp.bfloat16)    # (128, G*64)

        # ---- conv2 (1x1) + folded BN + ReLU (bf16 matmul, f32 epilogue; review #6)
        h2 = jnp.dot(w2, h1, preferred_element_type=jnp.float32)     # (16, G*64)
        h2 = jnp.maximum(h2 * s2 + b2, 0.0).astype(jnp.bfloat16)

        # ---- fc(640->100): weights pre-permuted so this equals torch's NCHW flatten.
        #      Block-diagonal gather is a depth-4 tree sum of lane-aligned slices
        #      instead of a 16-deep serial add chain (review #5).
        for g in range(G):
            h2_g = h2[:, g * SP:(g + 1) * SP]                        # (16, 64)
            gmat = jnp.dot(h2_g, wsp, preferred_element_type=jnp.float32)  # (16, 2048)
            pieces = [gmat[c:c + 1, c * H1_PAD:(c + 1) * H1_PAD]
                      for c in range(H2_PAD)]
            while len(pieces) > 1:
                pieces = [pieces[i] + pieces[i + 1]
                          for i in range(0, len(pieces), 2)]
            fc1_rows.append(jnp.maximum(pieces[0] + fb1, 0.0))       # (1, 128)

    # ---- fc2(100->1) batched over the whole tile + single output store (review #8)
    fc1_all = fc1_rows[0] if bt == 1 else jnp.concatenate(fc1_rows, axis=0)
    out = jnp.sum(fc1_all * fw2, axis=-1, keepdims=True) + fb2       # (bt, 1)
    o_ref[...] = out


# ----------------------------- wrapper ---------------------------------------

def _pick_batch_tile(n):
    # Keep the (bt, 1) output block tile-friendly: bt == n or a multiple of 8.
    if n <= 8:
        return n
    if n % 8 == 0:
        return 8   # review #7: can be raised to 16 on v6e/v7x (keep >=2 steps on v7x)
    return n       # odd batches: one tile (correct; forfeits grid parallelism)


def _pick_group(bt):
    for g in (4, 2, 1):    # 4 images -> 256 lanes (v6e/v7x full width), 2 -> 128 (v5e)
        if bt % g == 0:
            return g
    return 1


def classifier_forward(x_nchw, kp, pool_mat):
    n, cin, h, w = x_nchw.shape
    hw = h * w
    x = x_nchw.reshape(n, cin, hw)          # metadata-only reshape; stays f32 (review #9)
    bt = _pick_batch_tile(n)
    G = _pick_group(bt)

    def full_spec(a):
        nd = a.ndim
        return pl.BlockSpec(a.shape, lambda i, _nd=nd: (0,) * _nd)

    args = (x, pool_mat, kp["w1t"], kp["s1"], kp["b1"], kp["w2"], kp["s2"],
            kp["b2"], kp["wsp"], kp["fb1"], kp["fw2"], kp["fb2"])
    in_specs = ([pl.BlockSpec((bt, cin, hw), lambda i: (i, 0, 0))]
                + [full_spec(a) for a in args[1:]])

    flops = 2 * n * (cin * hw * 9 * SP            # pooling matmul
                     + 9 * cin * SP * H1_PAD      # conv1
                     + H1_PAD * SP * H2_PAD       # conv2
                     + H2_PAD * SP * H2_PAD * H1_PAD  # head
                     + H1_PAD)                    # fc2
    bytes_accessed = int(x.size * 4 + n * 4
                         + sum(int(a.size) * a.dtype.itemsize for a in args[1:]))
    cost = pl.CostEstimate(flops=int(flops), transcendentals=0,
                           bytes_accessed=bytes_accessed)

    kernel = functools.partial(_fused_classifier_kernel, group=G)
    return pl.pallas_call(
        kernel,
        out_shape=jax.ShapeDtypeStruct((n, 1), jnp.float32),
        grid=(n // bt,),
        in_specs=in_specs,
        out_specs=pl.BlockSpec((bt, 1), lambda i: (i, 0)),
        compiler_params=pltpu.CompilerParams(
            dimension_semantics=("parallel",),
            vmem_limit_bytes=48 * 1024 * 1024),
        cost_estimate=cost,
    )(*args)


# ----------------------------- host-side setup --------------------------------

def build_pool_weights(h_in, w_in, out=ALIGN):
    """AdaptiveAvgPool2d((out,out)) weights: pw[i,j,:,:] averages the input window
    of pooled cell (i,j)."""
    pw = np.zeros((out, out, h_in, w_in), np.float32)
    for i in range(out):
        h0 = (i * h_in) // out
        h1 = -((-(i + 1) * h_in) // out)          # ceil((i+1)*h_in/out)
        for j in range(out):
            w0 = (j * w_in) // out
            w1 = -((-(j + 1) * w_in) // out)
            pw[i, j, h0:h1, w0:w1] = 1.0 / ((h1 - h0) * (w1 - w0))
    return pw


def build_pool_im2col_matrix(h_in, w_in, out=ALIGN):
    """(H*W, 9*64) bf16 matrix folding AdaptiveAvgPool2d((8,8)), zero padding=1 and
    the 9 conv taps (im2col) into one contraction. Column t*64 + (oy*8+ox) holds the
    adaptive-pool weights of pooled cell (oy+ky-1, ox+kx-1) (zero on the pad border)."""
    pw = build_pool_weights(h_in, w_in, out)
    m = np.zeros((h_in * w_in, 9 * out * out), np.float32)
    for ky in range(3):
        for kx in range(3):
            t = ky * 3 + kx
            for oy in range(out):
                for ox in range(out):
                    py, px = oy + ky - 1, ox + kx - 1
                    if 0 <= py < out and 0 <= px < out:
                        m[:, t * out * out + oy * out + ox] = pw[py, px].reshape(-1)
    return jnp.asarray(m, dtype=jnp.bfloat16)


def init_torch_params(key, cin):
    ks = jax.random.split(key, 16)

    def nrm(k, shape, s):
        return jax.random.normal(k, shape, jnp.float32) * s

    p = {}
    p["conv1_w"] = nrm(ks[0], (HIDDEN1, cin, 3, 3), 0.05)
    p["conv1_b"] = nrm(ks[1], (HIDDEN1,), 0.05)
    p["bn1_gamma"] = jax.random.uniform(ks[2], (HIDDEN1,), jnp.float32, 0.5, 1.5)
    p["bn1_beta"] = nrm(ks[3], (HIDDEN1,), 0.1)
    p["bn1_mean"] = nrm(ks[4], (HIDDEN1,), 0.1)
    p["bn1_var"] = jax.random.uniform(ks[5], (HIDDEN1,), jnp.float32, 0.5, 1.5)
    p["conv2_w"] = nrm(ks[6], (HIDDEN2, HIDDEN1, 1, 1), 0.1)
    p["conv2_b"] = nrm(ks[7], (HIDDEN2,), 0.05)
    p["bn2_gamma"] = jax.random.uniform(ks[8], (HIDDEN2,), jnp.float32, 0.5, 1.5)
    p["bn2_beta"] = nrm(ks[9], (HIDDEN2,), 0.1)
    p["bn2_mean"] = nrm(ks[10], (HIDDEN2,), 0.1)
    p["bn2_var"] = jax.random.uniform(ks[11], (HIDDEN2,), jnp.float32, 0.5, 1.5)
    fan_in = HIDDEN2 * SP
    p["fc_w"] = nrm(ks[12], (HIDDEN1, fan_in), (2.0 / fan_in) ** 0.5)
    p["fc_b"] = nrm(ks[13], (HIDDEN1,), 0.05)
    p["fc2_w"] = nrm(ks[14], (1, HIDDEN1), (2.0 / HIDDEN1) ** 0.5)
    p["fc2_b"] = nrm(ks[15], (1,), 0.05)
    return p


def prepare_kernel_params(tp, cin):
    """One-time host-side re-layout: fold eval-mode BN, pad 100->128 / 10->16 with
    zeros, split conv1 weights per tap, permute fc weights to the kernel layout."""
    kp = {}
    # conv1: torch (H1, Cin, 3, 3) -> (9, H1_PAD, Cin) per-tap blocks (review #3).
    w1t = jnp.transpose(tp["conv1_w"], (2, 3, 0, 1)).reshape(9, HIDDEN1, cin)
    kp["w1t"] = jnp.pad(w1t, ((0, 0), (0, H1_PAD - HIDDEN1), (0, 0))).astype(jnp.bfloat16)
    scale1 = tp["bn1_gamma"] / jnp.sqrt(tp["bn1_var"] + BN_EPS)
    bias1 = (tp["conv1_b"] - tp["bn1_mean"]) * scale1 + tp["bn1_beta"]
    kp["s1"] = jnp.pad(scale1, (0, H1_PAD - HIDDEN1))[:, None]       # (128, 1)
    kp["b1"] = jnp.pad(bias1, (0, H1_PAD - HIDDEN1))[:, None]
    # conv2: torch (H2, H1, 1, 1) -> (H2_PAD, H1_PAD) bf16 (review #6)
    w2 = tp["conv2_w"][:, :, 0, 0]
    kp["w2"] = jnp.pad(w2, ((0, H2_PAD - HIDDEN2),
                            (0, H1_PAD - HIDDEN1))).astype(jnp.bfloat16)
    scale2 = tp["bn2_gamma"] / jnp.sqrt(tp["bn2_var"] + BN_EPS)
    bias2 = (tp["conv2_b"] - tp["bn2_mean"]) * scale2 + tp["bn2_beta"]
    kp["s2"] = jnp.pad(scale2, (0, H2_PAD - HIDDEN2))[:, None]       # (16, 1)
    kp["b2"] = jnp.pad(bias2, (0, H2_PAD - HIDDEN2))[:, None]
    # fc(640->100): torch column index is c2*64 + s (NCHW flatten). Re-lay-out so
    # wsp[s, c2*H1_PAD + j] = fc_w[j, c2*64 + s]; padded rows/cols are zero.
    fcw = tp["fc_w"].reshape(HIDDEN1, HIDDEN2, SP)                   # [j, c2, s]
    wsp = jnp.transpose(fcw, (2, 1, 0))                              # [s, c2, j]
    wsp = jnp.pad(wsp, ((0, 0), (0, H2_PAD - HIDDEN2), (0, H1_PAD - HIDDEN1)))
    kp["wsp"] = wsp.reshape(SP, H2_PAD * H1_PAD).astype(jnp.bfloat16)  # (64, 2048)
    kp["fb1"] = jnp.pad(tp["fc_b"], (0, H1_PAD - HIDDEN1))[None, :]  # (1, 128)
    kp["fw2"] = jnp.pad(tp["fc2_w"][0], (0, H1_PAD - HIDDEN1))[None, :]
    kp["fb2"] = tp["fc2_b"].reshape(1, 1)
    return kp


# ----------------------------- pure-JAX f32 reference -------------------------

def reference_forward(x, tp, pw):
    n = x.shape[0]
    pooled = jnp.einsum('nchw,ijhw->ncij', x, pw)                    # adaptive pool
    xp = jnp.pad(pooled, ((0, 0), (0, 0), (1, 1), (1, 1)))
    y1 = jnp.zeros((n, HIDDEN1, ALIGN, ALIGN), jnp.float32)
    for ky in range(3):
        for kx in range(3):
            y1 = y1 + jnp.einsum('ncij,oc->noij',
                                 xp[:, :, ky:ky + ALIGN, kx:kx + ALIGN],
                                 tp["conv1_w"][:, :, ky, kx])
    y1 = y1 + tp["conv1_b"][None, :, None, None]
    g1 = (tp["bn1_gamma"] / jnp.sqrt(tp["bn1_var"] + BN_EPS))
    y1 = (y1 - tp["bn1_mean"][None, :, None, None]) * g1[None, :, None, None] \
        + tp["bn1_beta"][None, :, None, None]
    y1 = jnp.maximum(y1, 0.0)
    y2 = jnp.einsum('ncij,oc->noij', y1, tp["conv2_w"][:, :, 0, 0]) \
        + tp["conv2_b"][None, :, None, None]
    g2 = (tp["bn2_gamma"] / jnp.sqrt(tp["bn2_var"] + BN_EPS))
    y2 = (y2 - tp["bn2_mean"][None, :, None, None]) * g2[None, :, None, None] \
        + tp["bn2_beta"][None, :, None, None]
    y2 = jnp.maximum(y2, 0.0)
    flat = y2.reshape(n, HIDDEN2 * SP)
    f1 = jnp.maximum(flat @ tp["fc_w"].T + tp["fc_b"], 0.0)
    return f1 @ tp["fc2_w"].T + tp["fc2_b"]


# ----------------------------- main -------------------------------------------

if __name__ == "__main__":
    key = jax.random.PRNGKey(0)
    k_in, k_par = jax.random.split(key)

    N, CIN, H, W = 2, 32, 16, 16                  # small demo shapes; Cin=512 also works
    x = jax.random.normal(k_in, (N, CIN, H, W), jnp.float32)   # NCHW, like PyTorch
    torch_params = init_torch_params(k_par, CIN)
    kernel_params = prepare_kernel_params(torch_params, CIN)
    pool_mat = build_pool_im2col_matrix(H, W)

    fwd = jax.jit(classifier_forward)
    out = jax.block_until_ready(fwd(x, kernel_params, pool_mat))

    assert out.shape == (N, 1), out.shape
    assert bool(jnp.all(jnp.isfinite(out)))

    # Tolerance-asserted reference check (bf16 matmuls vs pure-f32 reference).
    ref = reference_forward(x, torch_params, jnp.asarray(build_pool_weights(H, W)))
    max_err = float(jnp.max(jnp.abs(out - ref)))
    assert max_err < 0.1, f"max abs err {max_err}"
    print("KERNEL_OK")
</pallas_src>

<mosaic_0001>
module attributes {stable_mosaic.version = 11 : i64} {
  func.func @_fused_classifier_kernel(%arg0: i32, %arg1: memref<2x32x256xf32, #tpu.memory_space<vmem>>, %arg2: memref<256x576xbf16, #tpu.memory_space<vmem>>, %arg3: memref<9x128x32xbf16, #tpu.memory_space<vmem>>, %arg4: memref<128x1xf32, #tpu.memory_space<vmem>>, %arg5: memref<128x1xf32, #tpu.memory_space<vmem>>, %arg6: memref<16x128xbf16, #tpu.memory_space<vmem>>, %arg7: memref<16x1xf32, #tpu.memory_space<vmem>>, %arg8: memref<16x1xf32, #tpu.memory_space<vmem>>, %arg9: memref<64x2048xbf16, #tpu.memory_space<vmem>>, %arg10: memref<1x128xf32, #tpu.memory_space<vmem>>, %arg11: memref<1x128xf32, #tpu.memory_space<vmem>>, %arg12: memref<1x1xf32, #tpu.memory_space<vmem>>, %arg13: memref<2x1xf32, #tpu.memory_space<vmem>>) attributes {dimension_semantics = [#tpu.dimension_semantics<parallel>], iteration_bounds = array<i64: 1>, scalar_prefetch = 0 : i64, scratch_operands = 0 : i64, tpu.core_type = #tpu.core_type<tc>, window_params = [{transform_indices = @transform_0, window_bounds = array<i64: 2, 32, 256>}, {pipeline_mode = #tpu.pipeline_mode<synchronous>, transform_indices = @transform_1, window_bounds = array<i64: 256, 576>}, {pipeline_mode = #tpu.pipeline_mode<synchronous>, transform_indices = @transform_2, window_bounds = array<i64: 9, 128, 32>}, {pipeline_mode = #tpu.pipeline_mode<synchronous>, transform_indices = @transform_3, window_bounds = array<i64: 128, 1>}, {pipeline_mode = #tpu.pipeline_mode<synchronous>, transform_indices = @transform_4, window_bounds = array<i64: 128, 1>}, {pipeline_mode = #tpu.pipeline_mode<synchronous>, transform_indices = @transform_5, window_bounds = array<i64: 16, 128>}, {pipeline_mode = #tpu.pipeline_mode<synchronous>, transform_indices = @transform_6, window_bounds = array<i64: 16, 1>}, {pipeline_mode = #tpu.pipeline_mode<synchronous>, transform_indices = @transform_7, window_bounds = array<i64: 16, 1>}, {pipeline_mode = #tpu.pipeline_mode<synchronous>, transform_indices = @transform_8, window_bounds = array<i64: 64, 2048>}, {pipeline_mode = #tpu.pipeline_mode<synchronous>, transform_indices = @transform_9, window_bounds = array<i64: 1, 128>}, {pipeline_mode = #tpu.pipeline_mode<synchronous>, transform_indices = @transform_10, window_bounds = array<i64: 1, 128>}, {pipeline_mode = #tpu.pipeline_mode<synchronous>, transform_indices = @transform_11, window_bounds = array<i64: 1, 1>}, {transform_indices = @transform_12, window_bounds = array<i64: 2, 1>}]} {
    %c0 = arith.constant 0 : index
    %c0_0 = arith.constant 0 : index
    %0 = vector.load %arg4[%c0, %c0_0] : memref<128x1xf32, #tpu.memory_space<vmem>>, vector<128x1xf32>
    %c0_1 = arith.constant 0 : index
    %c0_2 = arith.constant 0 : index
    %1 = vector.load %arg5[%c0_1, %c0_2] : memref<128x1xf32, #tpu.memory_space<vmem>>, vector<128x1xf32>
    %c0_3 = arith.constant 0 : index
    %c0_4 = arith.constant 0 : index
    %2 = vector.load %arg6[%c0_3, %c0_4] : memref<16x128xbf16, #tpu.memory_space<vmem>>, vector<16x128xbf16>
    %c0_5 = arith.constant 0 : index
    %c0_6 = arith.constant 0 : index
    %3 = vector.load %arg7[%c0_5, %c0_6] : memref<16x1xf32, #tpu.memory_space<vmem>>, vector<16x1xf32>
    %c0_7 = arith.constant 0 : index
    %c0_8 = arith.constant 0 : index
    %4 = vector.load %arg8[%c0_7, %c0_8] : memref<16x1xf32, #tpu.memory_space<vmem>>, vector<16x1xf32>
    %c0_9 = arith.constant 0 : index
    %c0_10 = arith.constant 0 : index
    %5 = vector.load %arg9[%c0_9, %c0_10] : memref<64x2048xbf16, #tpu.memory_space<vmem>>, vector<64x2048xbf16>
    %c0_11 = arith.constant 0 : index
    %c0_12 = arith.constant 0 : index
    %6 = vector.load %arg10[%c0_11, %c0_12] : memref<1x128xf32, #tpu.memory_space<vmem>>, vector<1x128xf32>
    %c0_13 = arith.constant 0 : index
    %c0_14 = arith.constant 0 : index
    %7 = vector.load %arg11[%c0_13, %c0_14] : memref<1x128xf32, #tpu.memory_space<vmem>>, vector<1x128xf32>
    %c0_15 = arith.constant 0 : index
    %c0_16 = arith.constant 0 : index
    %8 = vector.load %arg12[%c0_15, %c0_16] : memref<1x1xf32, #tpu.memory_space<vmem>>, vector<1x1xf32>
    %c0_17 = arith.constant 0 : index
    %c0_18 = arith.constant 0 : index
    %c0_19 = arith.constant 0 : index
    %9 = vector.load %arg3[%c0_17, %c0_18, %c0_19] : memref<9x128x32xbf16, #tpu.memory_space<vmem>>, vector<1x128x32xbf16>
    %10 = vector.shape_cast %9 : vector<1x128x32xbf16> to vector<128x32xbf16>
    %c1 = arith.constant 1 : index
    %c0_20 = arith.constant 0 : index
    %c0_21 = arith.constant 0 : index
    %11 = vector.load %arg3[%c1, %c0_20, %c0_21] : memref<9x128x32xbf16, #tpu.memory_space<vmem>>, vector<1x128x32xbf16>
    %12 = vector.shape_cast %11 : vector<1x128x32xbf16> to vector<128x32xbf16>
    %c2 = arith.constant 2 : index
    %c0_22 = arith.constant 0 : index
    %c0_23 = arith.constant 0 : index
    %13 = vector.load %arg3[%c2, %c0_22, %c0_23] : memref<9x128x32xbf16, #tpu.memory_space<vmem>>, vector<1x128x32xbf16>
    %14 = vector.shape_cast %13 : vector<1x128x32xbf16> to vector<128x32xbf16>
    %c3 = arith.constant 3 : index
    %c0_24 = arith.constant 0 : index
    %c0_25 = arith.constant 0 : index
    %15 = vector.load %arg3[%c3, %c0_24, %c0_25] : memref<9x128x32xbf16, #tpu.memory_space<vmem>>, vector<1x128x32xbf16>
    %16 = vector.shape_cast %15 : vector<1x128x32xbf16> to vector<128x32xbf16>
    %c4 = arith.constant 4 : index
    %c0_26 = arith.constant 0 : index
    %c0_27 = arith.constant 0 : index
    %17 = vector.load %arg3[%c4, %c0_26, %c0_27] : memref<9x128x32xbf16, #tpu.memory_space<vmem>>, vector<1x128x32xbf16>
    %18 = vector.shape_cast %17 : vector<1x128x32xbf16> to vector<128x32xbf16>
    %c5 = arith.constant 5 : index
    %c0_28 = arith.constant 0 : index
    %c0_29 = arith.constant 0 : index
    %19 = vector.load %arg3[%c5, %c0_28, %c0_29] : memref<9x128x32xbf16, #tpu.memory_space<vmem>>, vector<1x128x32xbf16>
    %20 = vector.shape_cast %19 : vector<1x128x32xbf16> to vector<128x32xbf16>
    %c6 = arith.constant 6 : index
    %c0_30 = arith.constant 0 : index
    %c0_31 = arith.constant 0 : index
    %21 = vector.load %arg3[%c6, %c0_30, %c0_31] : memref<9x128x32xbf16, #tpu.memory_space<vmem>>, vector<1x128x32xbf16>
    %22 = vector.shape_cast %21 : vector<1x128x32xbf16> to vector<128x32xbf16>
    %c7 = arith.constant 7 : index
    %c0_32 = arith.constant 0 : index
    %c0_33 = arith.constant 0 : index
    %23 = vector.load %arg3[%c7, %c0_32, %c0_33] : memref<9x128x32xbf16, #tpu.memory_space<vmem>>, vector<1x128x32xbf16>
    %24 = vector.shape_cast %23 : vector<1x128x32xbf16> to vector<128x32xbf16>
    %c8 = arith.constant 8 : index
    %c0_34 = arith.constant 0 : index
    %c0_35 = arith.constant 0 : index
    %25 = vector.load %arg3[%c8, %c0_34, %c0_35] : memref<9x128x32xbf16, #tpu.memory_space<vmem>>, vector<1x128x32xbf16>
    %26 = vector.shape_cast %25 : vector<1x128x32xbf16> to vector<128x32xbf16>
    %c0_36 = arith.constant 0 : index
    %c0_37 = arith.constant 0 : index
    %c0_38 = arith.constant 0 : index
    %27 = vector.load %arg1[%c0_36, %c0_37, %c0_38] : memref<2x32x256xf32, #tpu.memory_space<vmem>>, vector<2x32x256xf32>
    %28 = arith.truncf %27 : vector<2x32x256xf32> to vector<2x32x256xbf16>
    %29 = vector.shape_cast %28 : vector<2x32x256xbf16> to vector<64x256xbf16>
    %c0_39 = arith.constant 0 : index
    %c0_40 = arith.constant 0 : index
    %30 = vector.load %arg2[%c0_39, %c0_40] : memref<256x576xbf16, #tpu.memory_space<vmem>>, vector<256x576xbf16>
    %cst = arith.constant dense<0.000000e+00> : vector<64x576xf32>
    %31 = tpu.matmul %29, %30, %cst {dimension_numbers = #tpu.dot_dimension_numbers<[1], [0], [0], [1], [0, 0, 1, 1], [], []>} : vector<64x256xbf16>, vector<256x576xbf16>, vector<64x576xf32> -> vector<64x576xf32>
    %32 = arith.truncf %31 : vector<64x576xf32> to vector<64x576xbf16>
    %33 = vector.extract_strided_slice %32 {offsets = [0, 0], sizes = [32, 64], strides = [1, 1]} : vector<64x576xbf16> to vector<32x64xbf16>
    %34 = vector.extract_strided_slice %32 {offsets = [32, 0], sizes = [32, 64], strides = [1, 1]} : vector<64x576xbf16> to vector<32x64xbf16>
    %35 = tpu.concatenate %33, %34 in 1 : vector<32x64xbf16>, vector<32x64xbf16> -> vector<32x128xbf16>
    %cst_41 = arith.constant dense<0.000000e+00> : vector<128x128xf32>
    %36 = tpu.matmul %10, %35, %cst_41 {dimension_numbers = #tpu.dot_dimension_numbers<[1], [0], [0], [1], [0, 0, 1, 1], [], []>} : vector<128x32xbf16>, vector<32x128xbf16>, vector<128x128xf32> -> vector<128x128xf32>
    %37 = vector.extract_strided_slice %32 {offsets = [0, 64], sizes = [32, 64], strides = [1, 1]} : vector<64x576xbf16> to vector<32x64xbf16>
    %38 = vector.extract_strided_slice %32 {offsets = [32, 64], sizes = [32, 64], strides = [1, 1]} : vector<64x576xbf16> to vector<32x64xbf16>
    %39 = tpu.concatenate %37, %38 in 1 : vector<32x64xbf16>, vector<32x64xbf16> -> vector<32x128xbf16>
    %cst_42 = arith.constant dense<0.000000e+00> : vector<128x128xf32>
    %40 = tpu.matmul %12, %39, %cst_42 {dimension_numbers = #tpu.dot_dimension_numbers<[1], [0], [0], [1], [0, 0, 1, 1], [], []>} : vector<128x32xbf16>, vector<32x128xbf16>, vector<128x128xf32> -> vector<128x128xf32>
    %41 = arith.addf %36, %40 : vector<128x128xf32>
    %42 = vector.extract_strided_slice %32 {offsets = [0, 128], sizes = [32, 64], strides = [1, 1]} : vector<64x576xbf16> to vector<32x64xbf16>
    %43 = vector.extract_strided_slice %32 {offsets = [32, 128], sizes = [32, 64], strides = [1, 1]} : vector<64x576xbf16> to vector<32x64xbf16>
    %44 = tpu.concatenate %42, %43 in 1 : vector<32x64xbf16>, vector<32x64xbf16> -> vector<32x128xbf16>
    %cst_43 = arith.constant dense<0.000000e+00> : vector<128x128xf32>
    %45 = tpu.matmul %14, %44, %cst_43 {dimension_numbers = #tpu.dot_dimension_numbers<[1], [0], [0], [1], [0, 0, 1, 1], [], []>} : vector<128x32xbf16>, vector<32x128xbf16>, vector<128x128xf32> -> vector<128x128xf32>
    %46 = arith.addf %41, %45 : vector<128x128xf32>
    %47 = vector.extract_strided_slice %32 {offsets = [0, 192], sizes = [32, 64], strides = [1, 1]} : vector<64x576xbf16> to vector<32x64xbf16>
    %48 = vector.extract_strided_slice %32 {offsets = [32, 192], sizes = [32, 64], strides = [1, 1]} : vector<64x576xbf16> to vector<32x64xbf16>
    %49 = tpu.concatenate %47, %48 in 1 : vector<32x64xbf16>, vector<32x64xbf16> -> vector<32x128xbf16>
    %cst_44 = arith.constant dense<0.000000e+00> : vector<128x128xf32>
    %50 = tpu.matmul %16, %49, %cst_44 {dimension_numbers = #tpu.dot_dimension_numbers<[1], [0], [0], [1], [0, 0, 1, 1], [], []>} : vector<128x32xbf16>, vector<32x128xbf16>, vector<128x128xf32> -> vector<128x128xf32>
    %51 = arith.addf %46, %50 : vector<128x128xf32>
    %52 = vector.extract_strided_slice %32 {offsets = [0, 256], sizes = [32, 64], strides = [1, 1]} : vector<64x576xbf16> to vector<32x64xbf16>
    %53 = vector.extract_strided_slice %32 {offsets = [32, 256], sizes = [32, 64], strides = [1, 1]} : vector<64x576xbf16> to vector<32x64xbf16>
    %54 = tpu.concatenate %52, %53 in 1 : vector<32x64xbf16>, vector<32x64xbf16> -> vector<32x128xbf16>
    %cst_45 = arith.constant dense<0.000000e+00> : vector<128x128xf32>
    %55 = tpu.matmul %18, %54, %cst_45 {dimension_numbers = #tpu.dot_dimension_numbers<[1], [0], [0], [1], [0, 0, 1, 1], [], []>} : vector<128x32xbf16>, vector<32x128xbf16>, vector<128x128xf32> -> vector<128x128xf32>
    %56 = arith.addf %51, %55 : vector<128x128xf32>
    %57 = vector.extract_strided_slice %32 {offsets = [0, 320], sizes = [32, 64], strides = [1, 1]} : vector<64x576xbf16> to vector<32x64xbf16>
    %58 = vector.extract_strided_slice %32 {offsets = [32, 320], sizes = [32, 64], strides = [1, 1]} : vector<64x576xbf16> to vector<32x64xbf16>
    %59 = tpu.concatenate %57, %58 in 1 : vector<32x64xbf16>, vector<32x64xbf16> -> vector<32x128xbf16>
    %cst_46 = arith.constant dense<0.000000e+00> : vector<128x128xf32>
    %60 = tpu.matmul %20, %59, %cst_46 {dimension_numbers = #tpu.dot_dimension_numbers<[1], [0], [0], [1], [0, 0, 1, 1], [], []>} : vector<128x32xbf16>, vector<32x128xbf16>, vector<128x128xf32> -> vector<128x128xf32>
    %61 = arith.addf %56, %60 : vector<128x128xf32>
    %62 = vector.extract_strided_slice %32 {offsets = [0, 384], sizes = [32, 64], strides = [1, 1]} : vector<64x576xbf16> to vector<32x64xbf16>
    %63 = vector.extract_strided_slice %32 {offsets = [32, 384], sizes = [32, 64], strides = [1, 1]} : vector<64x576xbf16> to vector<32x64xbf16>
    %64 = tpu.concatenate %62, %63 in 1 : vector<32x64xbf16>, vector<32x64xbf16> -> vector<32x128xbf16>
    %cst_47 = arith.constant dense<0.000000e+00> : vector<128x128xf32>
    %65 = tpu.matmul %22, %64, %cst_47 {dimension_numbers = #tpu.dot_dimension_numbers<[1], [0], [0], [1], [0, 0, 1, 1], [], []>} : vector<128x32xbf16>, vector<32x128xbf16>, vector<128x128xf32> -> vector<128x128xf32>
    %66 = arith.addf %61, %65 : vector<128x128xf32>
    %67 = vector.extract_strided_slice %32 {offsets = [0, 448], sizes = [32, 64], strides = [1, 1]} : vector<64x576xbf16> to vector<32x64xbf16>
    %68 = vector.extract_strided_slice %32 {offsets = [32, 448], sizes = [32, 64], strides = [1, 1]} : vector<64x576xbf16> to vector<32x64xbf16>
    %69 = tpu.concatenate %67, %68 in 1 : vector<32x64xbf16>, vector<32x64xbf16> -> vector<32x128xbf16>
    %cst_48 = arith.constant dense<0.000000e+00> : vector<128x128xf32>
    %70 = tpu.matmul %24, %69, %cst_48 {dimension_numbers = #tpu.dot_dimension_numbers<[1], [0], [0], [1], [0, 0, 1, 1], [], []>} : vector<128x32xbf16>, vector<32x128xbf16>, vector<128x128xf32> -> vector<128x128xf32>
    %71 = arith.addf %66, %70 : vector<128x128xf32>
    %72 = vector.extract_strided_slice %32 {offsets = [0, 512], sizes = [32, 64], strides = [1, 1]} : vector<64x576xbf16> to vector<32x64xbf16>
    %73 = vector.extract_strided_slice %32 {offsets = [32, 512], sizes = [32, 64], strides = [1, 1]} : vector<64x576xbf16> to vector<32x64xbf16>
    %74 = tpu.concatenate %72, %73 in 1 : vector<32x64xbf16>, vector<32x64xbf16> -> vector<32x128xbf16>
    %cst_49 = arith.constant dense<0.000000e+00> : vector<128x128xf32>
    %75 = tpu.matmul %26, %74, %cst_49 {dimension_numbers = #tpu.dot_dimension_numbers<[1], [0], [0], [1], [0, 0, 1, 1], [], []>} : vector<128x32xbf16>, vector<32x128xbf16>, vector<128x128xf32> -> vector<128x128xf32>
    %76 = arith.addf %71, %75 : vector<128x128xf32>
    %77 = vector.broadcast %0 : vector<128x1xf32> to vector<128x128xf32>
    %78 = arith.mulf %76, %77 : vector<128x128xf32>
    %79 = vector.broadcast %1 : vector<128x1xf32> to vector<128x128xf32>
    %80 = arith.addf %78, %79 : vector<128x128xf32>
    %cst_50 = arith.constant 0.000000e+00 : f32
    %81 = vector.broadcast %cst_50 : f32 to vector<128x128xf32>
    %82 = arith.maximumf %80, %81 : vector<128x128xf32>
    %83 = arith.truncf %82 : vector<128x128xf32> to vector<128x128xbf16>
    %cst_51 = arith.constant dense<0.000000e+00> : vector<16x128xf32>
    %84 = tpu.matmul %2, %83, %cst_51 {dimension_numbers = #tpu.dot_dimension_numbers<[1], [0], [0], [1], [0, 0, 1, 1], [], []>} : vector<16x128xbf16>, vector<128x128xbf16>, vector<16x128xf32> -> vector<16x128xf32>
    %85 = vector.broadcast %3 : vector<16x1xf32> to vector<16x128xf32>
    %86 = arith.mulf %84, %85 : vector<16x128xf32>
    %87 = vector.broadcast %4 : vector<16x1xf32> to vector<16x128xf32>
    %88 = arith.addf %86, %87 : vector<16x128xf32>
    %cst_52 = arith.constant 0.000000e+00 : f32
    %89 = vector.broadcast %cst_52 : f32 to vector<16x128xf32>
    %90 = arith.maximumf %88, %89 : vector<16x128xf32>
    %91 = arith.truncf %90 : vector<16x128xf32> to vector<16x128xbf16>
    %92 = vector.extract_strided_slice %91 {offsets = [0, 0], sizes = [16, 64], strides = [1, 1]} : vector<16x128xbf16> to vector<16x64xbf16>
    %cst_53 = arith.constant dense<0.000000e+00> : vector<16x2048xf32>
    %93 = tpu.matmul %92, %5, %cst_53 {dimension_numbers = #tpu.dot_dimension_numbers<[1], [0], [0], [1], [0, 0, 1, 1], [], []>} : vector<16x64xbf16>, vector<64x2048xbf16>, vector<16x2048xf32> -> vector<16x2048xf32>
    %94 = vector.extract_strided_slice %93 {offsets = [0, 0], sizes = [1, 128], strides = [1, 1]} : vector<16x2048xf32> to vector<1x128xf32>
    %95 = vector.extract_strided_slice %93 {offsets = [1, 128], sizes = [1, 128], strides = [1, 1]} : vector<16x2048xf32> to vector<1x128xf32>
    %96 = vector.extract_strided_slice %93 {offsets = [2, 256], sizes = [1, 128], strides = [1, 1]} : vector<16x2048xf32> to vector<1x128xf32>
    %97 = vector.extract_strided_slice %93 {offsets = [3, 384], sizes = [1, 128], strides = [1, 1]} : vector<16x2048xf32> to vector<1x128xf32>
    %98 = vector.extract_strided_slice %93 {offsets = [4, 512], sizes = [1, 128], strides = [1, 1]} : vector<16x2048xf32> to vector<1x128xf32>
    %99 = vector.extract_strided_slice %93 {offsets = [5, 640], sizes = [1, 128], strides = [1, 1]} : vector<16x2048xf32> to vector<1x128xf32>
    %100 = vector.extract_strided_slice %93 {offsets = [6, 768], sizes = [1, 128], strides = [1, 1]} : vector<16x2048xf32> to vector<1x128xf32>
    %101 = vector.extract_strided_slice %93 {offsets = [7, 896], sizes = [1, 128], strides = [1, 1]} : vector<16x2048xf32> to vector<1x128xf32>
    %102 = vector.extract_strided_slice %93 {offsets = [8, 1024], sizes = [1, 128], strides = [1, 1]} : vector<16x2048xf32> to vector<1x128xf32>
    %103 = vector.extract_strided_slice %93 {offsets = [9, 1152], sizes = [1, 128], strides = [1, 1]} : vector<16x2048xf32> to vector<1x128xf32>
    %104 = vector.extract_strided_slice %93 {offsets = [10, 1280], sizes = [1, 128], strides = [1, 1]} : vector<16x2048xf32> to vector<1x128xf32>
    %105 = vector.extract_strided_slice %93 {offsets = [11, 1408], sizes = [1, 128], strides = [1, 1]} : vector<16x2048xf32> to vector<1x128xf32>
    %106 = vector.extract_strided_slice %93 {offsets = [12, 1536], sizes = [1, 128], strides = [1, 1]} : vector<16x2048xf32> to vector<1x128xf32>
    %107 = vector.extract_strided_slice %93 {offsets = [13, 1664], sizes = [1, 128], strides = [1, 1]} : vector<16x2048xf32> to vector<1x128xf32>
    %108 = vector.extract_strided_slice %93 {offsets = [14, 1792], sizes = [1, 128], strides = [1, 1]} : vector<16x2048xf32> to vector<1x128xf32>
    %109 = vector.extract_strided_slice %93 {offsets = [15, 1920], sizes = [1, 128], strides = [1, 1]} : vector<16x2048xf32> to vector<1x128xf32>
    %110 = arith.addf %94, %95 : vector<1x128xf32>
    %111 = arith.addf %96, %97 : vector<1x128xf32>
    %112 = arith.addf %98, %99 : vector<1x128xf32>
    %113 = arith.addf %100, %101 : vector<1x128xf32>
    %114 = arith.addf %102, %103 : vector<1x128xf32>
    %115 = arith.addf %104, %105 : vector<1x128xf32>
    %116 = arith.addf %106, %107 : vector<1x128xf32>
    %117 = arith.addf %108, %109 : vector<1x128xf32>
    %118 = arith.addf %110, %111 : vector<1x128xf32>
    %119 = arith.addf %112, %113 : vector<1x128xf32>
    %120 = arith.addf %114, %115 : vector<1x128xf32>
    %121 = arith.addf %116, %117 : vector<1x128xf32>
    %122 = arith.addf %118, %119 : vector<1x128xf32>
    %123 = arith.addf %120, %121 : vector<1x128xf32>
    %124 = arith.addf %122, %123 : vector<1x128xf32>
    %125 = arith.addf %124, %6 : vector<1x128xf32>
    %cst_54 = arith.constant 0.000000e+00 : f32
    %126 = vector.broadcast %cst_54 : f32 to vector<1x128xf32>
    %127 = arith.maximumf %125, %126 : vector<1x128xf32>
    %128 = vector.extract_strided_slice %91 {offsets = [0, 64], sizes = [16, 64], strides = [1, 1]} : vector<16x128xbf16> to vector<16x64xbf16>
    %cst_55 = arith.constant dense<0.000000e+00> : vector<16x2048xf32>
    %129 = tpu.matmul %128, %5, %cst_55 {dimension_numbers = #tpu.dot_dimension_numbers<[1], [0], [0], [1], [0, 0, 1, 1], [], []>} : vector<16x64xbf16>, vector<64x2048xbf16>, vector<16x2048xf32> -> vector<16x2048xf32>
    %130 = vector.extract_strided_slice %129 {offsets = [0, 0], sizes = [1, 128], strides = [1, 1]} : vector<16x2048xf32> to vector<1x128xf32>
    %131 = vector.extract_strided_slice %129 {offsets = [1, 128], sizes = [1, 128], strides = [1, 1]} : vector<16x2048xf32> to vector<1x128xf32>
    %132 = vector.extract_strided_slice %129 {offsets = [2, 256], sizes = [1, 128], strides = [1, 1]} : vector<16x2048xf32> to vector<1x128xf32>
    %133 = vector.extract_strided_slice %129 {offsets = [3, 384], sizes = [1, 128], strides = [1, 1]} : vector<16x2048xf32> to vector<1x128xf32>
    %134 = vector.extract_strided_slice %129 {offsets = [4, 512], sizes = [1, 128], strides = [1, 1]} : vector<16x2048xf32> to vector<1x128xf32>
    %135 = vector.extract_strided_slice %129 {offsets = [5, 640], sizes = [1, 128], strides = [1, 1]} : vector<16x2048xf32> to vector<1x128xf32>
    %136 = vector.extract_strided_slice %129 {offsets = [6, 768], sizes = [1, 128], strides = [1, 1]} : vector<16x2048xf32> to vector<1x128xf32>
    %137 = vector.extract_strided_slice %129 {offsets = [7, 896], sizes = [1, 128], strides = [1, 1]} : vector<16x2048xf32> to vector<1x128xf32>
    %138 = vector.extract_strided_slice %129 {offsets = [8, 1024], sizes = [1, 128], strides = [1, 1]} : vector<16x2048xf32> to vector<1x128xf32>
    %139 = vector.extract_strided_slice %129 {offsets = [9, 1152], sizes = [1, 128], strides = [1, 1]} : vector<16x2048xf32> to vector<1x128xf32>
    %140 = vector.extract_strided_slice %129 {offsets = [10, 1280], sizes = [1, 128], strides = [1, 1]} : vector<16x2048xf32> to vector<1x128xf32>
    %141 = vector.extract_strided_slice %129 {offsets = [11, 1408], sizes = [1, 128], strides = [1, 1]} : vector<16x2048xf32> to vector<1x128xf32>
    %142 = vector.extract_strided_slice %129 {offsets = [12, 1536], sizes = [1, 128], strides = [1, 1]} : vector<16x2048xf32> to vector<1x128xf32>
    %143 = vector.extract_strided_slice %129 {offsets = [13, 1664], sizes = [1, 128], strides = [1, 1]} : vector<16x2048xf32> to vector<1x128xf32>
    %144 = vector.extract_strided_slice %129 {offsets = [14, 1792], sizes = [1, 128], strides = [1, 1]} : vector<16x2048xf32> to vector<1x128xf32>
    %145 = vector.extract_strided_slice %129 {offsets = [15, 1920], sizes = [1, 128], strides = [1, 1]} : vector<16x2048xf32> to vector<1x128xf32>
    %146 = arith.addf %130, %131 : vector<1x128xf32>
    %147 = arith.addf %132, %133 : vector<1x128xf32>
    %148 = arith.addf %134, %135 : vector<1x128xf32>
    %149 = arith.addf %136, %137 : vector<1x128xf32>
    %150 = arith.addf %138, %139 : vector<1x128xf32>
    %151 = arith.addf %140, %141 : vector<1x128xf32>
    %152 = arith.addf %142, %143 : vector<1x128xf32>
    %153 = arith.addf %144, %145 : vector<1x128xf32>
    %154 = arith.addf %146, %147 : vector<1x128xf32>
    %155 = arith.addf %148, %149 : vector<1x128xf32>
    %156 = arith.addf %150, %151 : vector<1x128xf32>
    %157 = arith.addf %152, %153 : vector<1x128xf32>
    %158 = arith.addf %154, %155 : vector<1x128xf32>
    %159 = arith.addf %156, %157 : vector<1x128xf32>
    %160 = arith.addf %158, %159 : vector<1x128xf32>
    %161 = arith.addf %160, %6 : vector<1x128xf32>
    %cst_56 = arith.constant 0.000000e+00 : f32
    %162 = vector.broadcast %cst_56 : f32 to vector<1x128xf32>
    %163 = arith.maximumf %161, %162 : vector<1x128xf32>
    %164 = tpu.concatenate %127, %163 in 0 : vector<1x128xf32>, vector<1x128xf32> -> vector<2x128xf32>
    %165 = vector.broadcast %7 : vector<1x128xf32> to vector<2x128xf32>
    %166 = arith.mulf %164, %165 : vector<2x128xf32>
    %cst_57 = arith.constant dense<0.000000e+00> : vector<2xf32>
    %167 = vector.multi_reduction <add>, %166, %cst_57 [1] : vector<2x128xf32> to vector<2xf32>
    %168 = vector.shape_cast %167 : vector<2xf32> to vector<2x1xf32>
    %169 = vector.broadcast %8 : vector<1x1xf32> to vector<2x1xf32>
    %170 = arith.addf %168, %169 : vector<2x1xf32>
    %c0_58 = arith.constant 0 : index
    %c0_59 = arith.constant 0 : index
    %171 = vector.load %arg13[%c0_58, %c0_59] : memref<2x1xf32, #tpu.memory_space<vmem>>, vector<2x1xf32>
    tpu.vector_store %arg13[%c0_58, %c0_59], %170 {strides = array<i32>} : memref<2x1xf32, #tpu.memory_space<vmem>>, vector<2x1xf32>,
    return
  }
  func.func @transform_0(%arg0: i32) -> (i32, i32, i32) {
    %c0_i32 = arith.constant 0 : i32
    %c0_i32_0 = arith.constant 0 : i32
    %c0_i32_1 = arith.constant 0 : i32
    return %arg0, %c0_i32, %c0_i32_0 : i32, i32, i32
  }
  func.func @transform_1(%arg0: i32) -> (i32, i32) {
    %c0_i32 = arith.constant 0 : i32
    %c0_i32_0 = arith.constant 0 : i32
    %c0_i32_1 = arith.constant 0 : i32
    return %c0_i32, %c0_i32_0 : i32, i32
  }
  func.func @transform_2(%arg0: i32) -> (i32, i32, i32) {
    %c0_i32 = arith.constant 0 : i32
    %c0_i32_0 = arith.constant 0 : i32
    %c0_i32_1 = arith.constant 0 : i32
    %c0_i32_2 = arith.constant 0 : i32
    return %c0_i32, %c0_i32_0, %c0_i32_1 : i32, i32, i32
  }
  func.func @transform_3(%arg0: i32) -> (i32, i32) {
    %c0_i32 = arith.constant 0 : i32
    %c0_i32_0 = arith.constant 0 : i32
    %c0_i32_1 = arith.constant 0 : i32
    return %c0_i32, %c0_i32_0 : i32, i32
  }
  func.func @transform_4(%arg0: i32) -> (i32, i32) {
    %c0_i32 = arith.constant 0 : i32
    %c0_i32_0 = arith.constant 0 : i32
    %c0_i32_1 = arith.constant 0 : i32
    return %c0_i32, %c0_i32_0 : i32, i32
  }
  func.func @transform_5(%arg0: i32) -> (i32, i32) {
    %c0_i32 = arith.constant 0 : i32
    %c0_i32_0 = arith.constant 0 : i32
    %c0_i32_1 = arith.constant 0 : i32
    return %c0_i32, %c0_i32_0 : i32, i32
  }
  func.func @transform_6(%arg0: i32) -> (i32, i32) {
    %c0_i32 = arith.constant 0 : i32
    %c0_i32_0 = arith.constant 0 : i32
    %c0_i32_1 = arith.constant 0 : i32
    return %c0_i32, %c0_i32_0 : i32, i32
  }
  func.func @transform_7(%arg0: i32) -> (i32, i32) {
    %c0_i32 = arith.constant 0 : i32
    %c0_i32_0 = arith.constant 0 : i32
    %c0_i32_1 = arith.constant 0 : i32
    return %c0_i32, %c0_i32_0 : i32, i32
  }
  func.func @transform_8(%arg0: i32) -> (i32, i32) {
    %c0_i32 = arith.constant 0 : i32
    %c0_i32_0 = arith.constant 0 : i32
    %c0_i32_1 = arith.constant 0 : i32
    return %c0_i32, %c0_i32_0 : i32, i32
  }
  func.func @transform_9(%arg0: i32) -> (i32, i32) {
    %c0_i32 = arith.constant 0 : i32
    %c0_i32_0 = arith.constant 0 : i32
    %c0_i32_1 = arith.constant 0 : i32
    return %c0_i32, %c0_i32_0 : i32, i32
  }
  func.func @transform_10(%arg0: i32) -> (i32, i32) {
    %c0_i32 = arith.constant 0 : i32
    %c0_i32_0 = arith.constant 0 : i32
    %c0_i32_1 = arith.constant 0 : i32
    return %c0_i32, %c0_i32_0 : i32, i32
  }
  func.func @transform_11(%arg0: i32) -> (i32, i32) {
    %c0_i32 = arith.constant 0 : i32
    %c0_i32_0 = arith.constant 0 : i32
    %c0_i32_1 = arith.constant 0 : i32
    return %c0_i32, %c0_i32_0 : i32, i32
  }
  func.func @transform_12(%arg0: i32) -> (i32, i32) {
    %c0_i32 = arith.constant 0 : i32
    %c0_i32_0 = arith.constant 0 : i32
    return %arg0, %c0_i32 : i32, i32
  }
}

</mosaic_0001>

<bundles_post_ra>
// kernel: classifier_forward.1
= control target key start
LH: loop header
LB: loop body
LE: loop exit
PB: predicated region body
PF: predicated region fallthrough
CT: control target
= control target key end

     0   :  { %vm1137_vm0 = vcmask 261120   ;;  %s5160_s15 = smov 64   ;;  %vm1074_vm1 = vcmask 523264   ;;  %vm5163_vm2 = vmmov 0   ;;  %vm4153_vm3 = vcmask 1040384   ;;  %s6786_s1 = inlined_call_operand.vmem [shape: bf16[256,576], index: 1, kind: input, shape index: {}]   ;;  %s6787_s0 = inlined_call_operand.vmem [shape: f32[2,32,256], index: 0, kind: input, shape index: {}]   ;;  %s6788_s2 = inlined_call_operand.vmem [shape: bf16[9,128,32], index: 2, kind: input, shape index: {}]   ;;  %s6789_s3 = inlined_call_operand.vmem [shape: f32[128,1], index: 3, kind: input, shape index: {}]   ;;  %s6790_s4 = inlined_call_operand.vmem [shape: f32[128,1], index: 4, kind: input, shape index: {}]   ;;  %s6791_s6 = inlined_call_operand.vmem [shape: f32[16,1], index: 6, kind: input, shape index: {}]   ;;  %s6792_s7 = inlined_call_operand.vmem [shape: f32[16,1], index: 7, kind: input, shape index: {}]   ;;  %s6793_s5 = inlined_call_operand.vmem [shape: bf16[16,128], index: 5, kind: input, shape index: {}]   ;;  %s6794_s8 = inlined_call_operand.vmem [shape: bf16[64,2048], index: 8, kind: input, shape index: {}]   ;;  %s6795_s11 = inlined_call_operand.<no memory space> [shape: f32[1,1], index: 11, kind: input, shape index: {}]   ;;  %s6796_s9 = inlined_call_operand.vmem [shape: f32[1,128], index: 9, kind: input, shape index: {}]   ;;  %s6797_s10 = inlined_call_operand.vmem [shape: f32[1,128], index: 10, kind: input, shape index: {}]   ;;  %s6798_s12 = inlined_call_operand.vmem [shape: f32[2,1], index: 12, kind: output, shape index: {}]  }
   0x1   :  { %v4975_v0 = vld [vmem:[%s6786_s1 + $0x11c] ss:$20 sps:$4 sm:$0xff]   ;;  %v4977_v1 = vld [vmem:[%s6786_s1 + $0x118] ss:$20 sps:$4 sm:$0xff]   ;;  %v4978_v2 = vld [vmem:[%s6786_s1 + $0xf4] ss:$20 sps:$4 sm:$0xff]  }
   0x2   :  { %837 = vmatprep.subr.bf16.mxu0 %v4975_v0  ;;  %v4980_v3 = vld [vmem:[%s6786_s1 + $0xf0] ss:$20 sps:$4 sm:$0xff]   ;;  %v4981_v4 = vld [vmem:[%s6786_s1 + $0xcc] ss:$20 sps:$4 sm:$0xff]   ;;  %v4983_v7 = vld [vmem:[%s6786_s1 + $0xc8] ss:$20 sps:$4 sm:$0xff]  }
   0x3   :  { %838 = vmatpush1.bf16.msra.mxu0 %v4977_v1  ;;  %v4986_v5 = vld [vmem:[%s6786_s1 + $0x124] ss:$20 sps:$4 sm:$0xff]   ;;  %v4989_v6 = vld [vmem:[%s6786_s1 + $0x120] ss:$20 sps:$4 sm:$0xff]   ;;  %v4992_v9 = vld [vmem:[%s6786_s1 + $0xfc] ss:$20 sps:$4 sm:$0xff]  }
   0x4   :  { %839 = vmatprep.subr.bf16.mxu0 %v4978_v2  ;;  %910 = vmatprep.subr.bf16.mxu1 %v4986_v5  ;;  %v4984_v8 = vld [vmem:[%s6786_s1 + $0xa4] ss:$20 sps:$4 sm:$0xff]   ;;  %v4988_v11 = vld [vmem:[%s6786_s1 + $0xa0] ss:$20 sps:$4 sm:$0xff]   ;;  %v4990_v12 = vld [vmem:[%s6786_s1 + $0x7c] ss:$20 sps:$4 sm:$0xff]  }
   0x5   :  { %911 = vmatpush1.bf16.msra.mxu1 %v4989_v6  ;;  %v4995_v10 = vld [vmem:[%s6786_s1 + $0xf8] ss:$20 sps:$4 sm:$0xff]   ;;  %v4998_v13 = vld [vmem:[%s6786_s1 + $0xd4] ss:$20 sps:$4 sm:$0xff]   ;;  %v5001_v14 = vld [vmem:[%s6786_s1 + $0xd0] ss:$20 sps:$4 sm:$0xff]  }
   0x6   :  { %912 = vmatprep.subr.bf16.mxu1 %v4992_v9  ;;  %v5004_v15 = vld [vmem:[%s6786_s1 + $0xac] ss:$20 sps:$4 sm:$0xff]   ;;  %v4996_v17 = vld [vmem:[%s6786_s1 + $0x54] ss:$20 sps:$4 sm:$0xff]   ;;  %v5010_v19 = vld [vmem:[%s6786_s1 + $0x84] ss:$20 sps:$4 sm:$0xff]  }
   0x7   :  { %840 = vmatpush1.bf16.msra.mxu0 %v4980_v3  ;;  %v4994_v16 = vld [vmem:[%s6786_s1 + $0x78] ss:$20 sps:$4 sm:$0xff]   ;;  %v5007_v18 = vld [vmem:[%s6786_s1 + $0xa8] ss:$20 sps:$4 sm:$0xff]   ;;  %v5000_v20 = vld [vmem:[%s6786_s1 + $0x50] ss:$20 sps:$4 sm:$0xff]  }
   0x8   :  { %841 = vmatprep.subr.bf16.mxu0 %v4981_v4  ;;  %v5002_v21 = vld [vmem:[%s6786_s1 + $0x2c] ss:$20 sps:$4 sm:$0xff]   ;;  %v5016_v23 = vld [vmem:[%s6786_s1 + $0x5c] ss:$20 sps:$4 sm:$0xff]   ;;  %v5008_v25 = vld [vmem:[%s6786_s1 + $0x4] ss:$20 sps:$4 sm:$0xff]  }
   0x9   :  { %913 = vmatpush1.bf16.msra.mxu1 %v4995_v10  ;;  %v5013_v22 = vld [vmem:[%s6786_s1 + $0x80] ss:$20 sps:$4 sm:$0xff]   ;;  %v5006_v24 = vld [vmem:[%s6786_s1 + $0x28] ss:$20 sps:$4 sm:$0xff]   ;;  %v5019_v26 = vld [vmem:[%s6786_s1 + $0x58] ss:$20 sps:$4 sm:$0xff]  }
   0xa   :  { %914 = vmatprep.subr.bf16.mxu1 %v4998_v13  ;;  %v5022_v27 = vld [vmem:[%s6786_s1 + $0x34] ss:$20 sps:$4 sm:$0xff]   ;;  %v5014_v29 = vld [vmem:[%s6786_s1 + $0x25c] ss:$20 sps:$4 sm:$0xff]   ;;  %v5028_v31 = vld [vmem:[%s6786_s1 + $0xc] ss:$20 sps:$4 sm:$0xff]  }
   0xb   :  { %842 = vmatpush1.bf16.msra.mxu0 %v4983_v7  ;;  %v5012_v28 = vld [vmem:[%s6786_s1] ss:$20 sps:$4 sm:$0xff]   ;;  %v5025_v30 = vld [vmem:[%s6786_s1 + $0x30] ss:$20 sps:$4 sm:$0xff]   ;;  %v5018_v32 = vld [vmem:[%s6786_s1 + $0x258] ss:$20 sps:$4 sm:$0xff]  }
   0xc   :  { %843 = vmatprep.subr.bf16.mxu0 %v4984_v8  ;;  %v5020_v33 = vld [vmem:[%s6786_s1 + $0x234] ss:$20 sps:$4 sm:$0xff]   ;;  %v5034_v35 = vld [vmem:[%s6786_s1 + $0x264] ss:$20 sps:$4 sm:$0xff]   ;;  %v5026_v37 = vld [vmem:[%s6786_s1 + $0x20c] ss:$20 sps:$4 sm:$0xff]  }
   0xd   :  { %915 = vmatpush1.bf16.msra.mxu1 %v5001_v14  ;;  %v5031_v34 = vld [vmem:[%s6786_s1 + $0x8] ss:$20 sps:$4 sm:$0xff]   ;;  %v5024_v36 = vld [vmem:[%s6786_s1 + $0x230] ss:$20 sps:$4 sm:$0xff]   ;;  %v5037_v38 = vld [vmem:[%s6786_s1 + $0x260] ss:$20 sps:$4 sm:$0xff]  }
   0xe   :  { %916 = vmatprep.subr.bf16.mxu1 %v5004_v15  ;;  %v5040_v39 = vld [vmem:[%s6786_s1 + $0x23c] ss:$20 sps:$4 sm:$0xff]   ;;  %v302_v40 = vld [vmem:[%s6787_s0 + $0x8] sm:$0xff]  ;;  %v5032_v42 = vld [vmem:[%s6786_s1 + $0x1e4] ss:$20 sps:$4 sm:$0xff]   ;;  %vm4162_vm4 = vcmask 1041408  }
   0xf   :  { %844 = vmatpush1.bf16.msra.mxu0 %v4988_v11  ;;  %v5030_v41 = vld [vmem:[%s6786_s1 + $0x208] ss:$20 sps:$4 sm:$0xff]   ;;  %v5043_v44 = vld [vmem:[%s6786_s1 + $0x238] ss:$20 sps:$4 sm:$0xff]   ;;  %v5036_v47 = vld [vmem:[%s6786_s1 + $0x1e0] ss:$20 sps:$4 sm:$0xff]  }
  0x10   :  { %845 = vmatprep.subr.bf16.mxu0 %v4990_v12  ;;  %v304_v43 = vld [vmem:[%s6787_s0 + $0x18] sm:$0xff]  ;;  %v5046_v46 = vld [vmem:[%s6786_s1 + $0x214] ss:$20 sps:$4 sm:$0xff]   ;;  %v5049_v49 = vld [vmem:[%s6786_s1 + $0x210] ss:$20 sps:$4 sm:$0xff]   ;;  %vm4173_vm5 = vcmask 1024  }
  0x11   :  { %917 = vmatpush1.bf16.msra.mxu1 %v5007_v18  ;;  %v5364_v45 = vpack.c.bf16 %v304_v43, %v302_v40  ;;  %v5038_v48 = vld [vmem:[%s6786_s1 + $0x1bc] ss:$20 sps:$4 sm:$0xff]   ;;  %v5052_v50 = vld [vmem:[%s6786_s1 + $0x1ec] ss:$20 sps:$4 sm:$0xff]   ;;  %v5044_v52 = vld [vmem:[%s6786_s1 + $0x194] ss:$20 sps:$4 sm:$0xff]  }
  0x12   :  { %918 = vmatprep.subr.bf16.mxu1 %v5010_v19  ;;  %v5042_v51 = vld [vmem:[%s6786_s1 + $0x1b8] ss:$20 sps:$4 sm:$0xff]   ;;  %v5055_v53 = vld [vmem:[%s6786_s1 + $0x1e8] ss:$20 sps:$4 sm:$0xff]   ;;  %v5048_v55 = vld [vmem:[%s6786_s1 + $0x190] ss:$20 sps:$4 sm:$0xff]  }
  0x13   :  { %846 = vmatpush1.bf16.msra.mxu0 %v4994_v16  ;;  %869 = vmatprep.mubr.bf16.mxu0 %v5364_v45  ;;  %v5058_v54 = vld [vmem:[%s6786_s1 + $0x1c4] ss:$20 sps:$4 sm:$0xff]   ;;  %v5050_v56 = vld [vmem:[%s6786_s1 + $0x16c] ss:$20 sps:$4 sm:$0xff]   ;;  %v5062_v58 = vld [vmem:[%s6786_s1 + $0x19c] ss:$20 sps:$4 sm:$0xff]  }
  0x14   :  { %847 = vmatprep.subr.bf16.mxu0 %v4996_v17  ;;  %942 = vmatprep.mubr.bf16.mxu1 %v5364_v45  ;;  %v5061_v57 = vld [vmem:[%s6786_s1 + $0x1c0] ss:$20 sps:$4 sm:$0xff]   ;;  %v5054_v59 = vld [vmem:[%s6786_s1 + $0x168] ss:$20 sps:$4 sm:$0xff]   ;;  %v5056_v60 = vld [vmem:[%s6786_s1 + $0x144] ss:$20 sps:$4 sm:$0xff]  }
  0x15   :  { %919 = vmatpush1.bf16.msra.mxu1 %v5013_v22  ;;  %v5064_v61 = vld [vmem:[%s6786_s1 + $0x198] ss:$20 sps:$4 sm:$0xff]   ;;  %v5060_v62 = vld [vmem:[%s6786_s1 + $0x140] ss:$20 sps:$4 sm:$0xff]   ;;  %v5067_v2 = vld [vmem:[%s6786_s1 + $0x268] ss:$20 sps:$4 sm:$0xff]  }
  0x16   :  { %920 = vmatprep.subr.bf16.mxu1 %v5016_v23  ;;  %v301_v63 = vld [vmem:[%s6787_s0] sm:$0xff]  ;;  %v303_v0 = vld [vmem:[%s6787_s0 + $0x10] sm:$0xff]  ;;  %v306_v4 = vld [vmem:[%s6787_s0 + $0x28] sm:$0xff] }
  0x17   :  { %848 = vmatpush1.bf16.msra.mxu0 %v5000_v20  ;;  %v5065_v1 = vld [vmem:[%s6786_s1 + $0x174] ss:$20 sps:$4 sm:$0xff]   ;;  %v5068_v3 = vld [vmem:[%s6786_s1 + $0x170] ss:$20 sps:$4 sm:$0xff]   ;;  %v308_v5 = vld [vmem:[%s6787_s0 + $0x38] sm:$0xff]  ;;  %v5443_v7 = vpack.c.bf16 %v303_v0, %v301_v63 }
  0x18   :  { %849 = vmatprep.subr.bf16.mxu0 %v5002_v21  ;;  %v5070_v6 = vld [vmem:[%s6786_s1 + $0x14c] ss:$20 sps:$4 sm:$0xff]   ;;  %v5069_v8 = vld [vmem:[%s6786_s1 + $0x128] ss:$20 sps:$4 sm:$0xff]   ;;  %v5448_v9 = vpack.c.bf16 %v308_v5, %v306_v4  ;;  %v307_v13 = vld [vmem:[%s6787_s0 + $0x30] sm:$0xff] }
  0x19   :  { %921 = vmatpush1.bf16.msra.mxu1 %v5019_v26  ;;  %v5072_v10 = vld [vmem:[%s6786_s1 + $0x240] ss:$20 sps:$4 sm:$0xff]   ;;  %v5073_v11 = vld [vmem:[%s6786_s1 + $0x148] ss:$20 sps:$4 sm:$0xff]   ;;  %v5075_v15 = vld [vmem:[%s6786_s1 + $0x218] ss:$20 sps:$4 sm:$0xff]  }
  0x1a   :  { %922 = vmatprep.subr.bf16.mxu1 %v5022_v27  ;;  %v305_v12 = vld [vmem:[%s6787_s0 + $0x20] sm:$0xff]  ;;  %v310_v16 = vld [vmem:[%s6787_s0 + $0x48] sm:$0xff]  ;;  %v312_v17 = vld [vmem:[%s6787_s0 + $0x58] sm:$0xff] }
  0x1b   :  { %850 = vmatpush1.bf16.msra.mxu0 %v5006_v24  ;;  %v5074_v14 = vld [vmem:[%s6786_s1 + $0x100] ss:$20 sps:$4 sm:$0xff]   ;;  %v5476_v18 = vpack.c.bf16 %v307_v13, %v305_v12  ;;  %v5076_v19 = vld [vmem:[%s6786_s1 + $0xd8] ss:$20 sps:$4 sm:$0xff]   ;;  %v5482_v20 = vpack.c.bf16 %v312_v17, %v310_v16  ;;  %v5077_v21 = vld [vmem:[%s6786_s1 + $0x1f0] ss:$20 sps:$4 sm:$0xff]  }
  0x1c   :  { %851 = vmatprep.subr.bf16.mxu0 %v5008_v25  ;;  %v309_v22 = vld [vmem:[%s6787_s0 + $0x40] sm:$0xff]  ;;  %v311_v23 = vld [vmem:[%s6787_s0 + $0x50] sm:$0xff]  ;;  %v5079_v25 = vld [vmem:[%s6786_s1 + $0x1c8] ss:$20 sps:$4 sm:$0xff]  }
  0x1d   :  { %923 = vmatpush1.bf16.msra.mxu1 %v5025_v30  ;;  %v5078_v24 = vld [vmem:[%s6786_s1 + $0xb0] ss:$20 sps:$4 sm:$0xff]   ;;  %v314_v26 = vld [vmem:[%s6787_s0 + $0x68] sm:$0xff]  ;;  %v316_v27 = vld [vmem:[%s6787_s0 + $0x78] sm:$0xff] }
  0x1e   :  { %924 = vmatprep.subr.bf16.mxu1 %v5028_v31  ;;  %v324_v30 = vpack.c.bf16 %v316_v27, %v314_v26  ;;  %v5081_v31 = vld [vmem:[%s6786_s1 + $0x1a0] ss:$20 sps:$4 sm:$0xff]  }
  0x1f   :  { %852 = vmatpush1.bf16.msra.mxu0 %v5012_v28  ;;  %v321_v28 = vpack.c.bf16 %v311_v23, %v309_v22 }
  0x20   :  { %853 = vmatprep.subr.bf16.mxu0 %v5014_v29  ;;  %v5080_v29 = vld [vmem:[%s6786_s1 + $0x88] ss:$20 sps:$4 sm:$0xff]  }
  0x21   :  { %925 = vmatpush1.bf16.msra.mxu1 %v5031_v34  ;;  %v5082_v34 = vld [vmem:[%s6786_s1 + $0x60] ss:$20 sps:$4 sm:$0xff]  }
  0x22   :  { %926 = vmatprep.subr.bf16.mxu1 %v5034_v35  ;;  %v5083_v35 = vld [vmem:[%s6786_s1 + $0x178] ss:$20 sps:$4 sm:$0xff]  }
  0x23   :  { %854 = vmatpush2.bf16.msra.mxu0 %v5018_v32  ;;  %v313_v32 = vld [vmem:[%s6787_s0 + $0x60] sm:$0xff] }
  0x24   :  { %855 = vmatprep.subr.bf16.mxu0 %v5020_v33  ;;  %v315_v33 = vld [vmem:[%s6787_s0 + $0x70] sm:$0xff] }
  0x25   :  { %927 = vmatpush2.bf16.msra.mxu1 %v5037_v38  ;;  %v5085_v38 = vld [vmem:[%s6786_s1 + $0x150] ss:$20 sps:$4 sm:$0xff]  }
  0x26   :  { %928 = vmatprep.subr.bf16.mxu1 %v5040_v39  ;;  %v5086_v39 = vld [vmem:[%s6786_s1 + $0x10] ss:$20 sps:$4 sm:$0xff]  }
  0x27   :  { %856 = vmatpush2.bf16.msra.mxu0 %v5024_v36  ;;  %v323_v36 = vpack.c.bf16 %v315_v33, %v313_v32 }
  0x28   :  { %857 = vmatprep.subr.bf16.mxu0 %v5026_v37  ;;  %v5084_v37 = vld [vmem:[%s6786_s1 + $0x38] ss:$20 sps:$4 sm:$0xff]  }
  0x29   :  { %929 = vmatpush2.bf16.msra.mxu1 %v5043_v44 }
  0x2a   :  { %930 = vmatprep.subr.bf16.mxu1 %v5046_v46 }
  0x2b   :  { %858 = vmatpush2.bf16.msra.mxu0 %v5030_v41 }
  0x2c   :  { %859 = vmatprep.subr.bf16.mxu0 %v5032_v42 }
  0x2d   :  { %931 = vmatpush2.bf16.msra.mxu1 %v5049_v49 }
  0x2e   :  { %932 = vmatprep.subr.bf16.mxu1 %v5052_v50 }
  0x2f   :  { %860 = vmatpush2.bf16.msra.mxu0 %v5036_v47  ;;  %v5087_v47 = vld [vmem:[%s6788_s2 + $0x40] sm:$0xff]  }
  0x30   :  { %861 = vmatprep.subr.bf16.mxu0 %v5038_v48 }
  0x31   :  { %933 = vmatpush2.bf16.msra.mxu1 %v5055_v53 }
  0x32   :  { %934 = vmatprep.subr.bf16.mxu1 %v5058_v54 }
  0x33   :  { %862 = vmatpush2.bf16.msra.mxu0 %v5042_v51 }
  0x34   :  { %863 = vmatprep.subr.bf16.mxu0 %v5044_v52 }
  0x35   :  { %935 = vmatpush2.bf16.msra.mxu1 %v5061_v57 }
  0x36   :  { %936 = vmatprep.subr.bf16.mxu1 %v5062_v58 }
  0x37   :  { %864 = vmatpush2.bf16.msra.mxu0 %v5048_v55 }
  0x38   :  { %865 = vmatprep.subr.bf16.mxu0 %v5050_v56 }
  0x39   :  { %937 = vmatpush2.bf16.msra.mxu1 %v5064_v61 }
  0x3a   :  { %938 = vmatprep.subr.bf16.mxu1 %v5065_v1 }
  0x3b   :  { %866 = vmatpush2.bf16.msra.mxu0 %v5054_v59 }
  0x3c   :  { %867 = vmatprep.subr.bf16.mxu0 %v5056_v60 }
  0x3d   :  { %939 = vmatpush2.bf16.msra.mxu1 %v5068_v3  ;;  %v5092_v3 = vld [vmem:[%s6788_s2] sm:$0xff]  }
  0x3e   :  { %940 = vmatprep.subr.bf16.mxu1 %v5070_v6 }
  0x3f   :  { %868 = vmatpush2.bf16.msra.mxu0 %v5060_v62 }
  0x40   :  { %4614 = vmatprep.subr.bf16.mxu0 %v5067_v2 }
  0x41   :  { %941 = vmatpush2.bf16.msra.mxu1 %v5073_v11 }
  0x42   :  { %870 = vmatmul.mubr.bf16.vlgmr.msra.gmra.mxu0 %v5443_v7  ;;  %4953 = vmatprep.subr.bf16.mxu1 %v5067_v2 }
  0x43   :  { %4615 = vmatpush3.bf16.msra.mxu0 %v5069_v8  ;;  %879 = vmatprep.mubr.bf16.mxu0 %v5448_v9 }
  0x44   :  { %4616 = vmatprep.subr.bf16.mxu0 %v5072_v10  ;;  %943 = vmatmul.mubr.bf16.vlgmr.msra.gmra.mxu1 %v5443_v7 }
  0x45   :  { %4961 = vmatpush3.bf16.msra.mxu1 %v5069_v8  ;;  %952 = vmatprep.mubr.bf16.mxu1 %v5448_v9 }
  0x46   :  { %4954 = vmatprep.subr.bf16.mxu1 %v5072_v10 }
  0x47   :  { %4617 = vmatpush3.bf16.msra.mxu0 %v5074_v14 }
  0x48   :  { %4618 = vmatprep.subr.bf16.mxu0 %v5075_v15 }
  0x49   :  { %4962 = vmatpush3.bf16.msra.mxu1 %v5074_v14 }
  0x4a   :  { %880 = vmatmul.mubr.bf16.gmra.mxu0 %v5476_v18  ;;  %4955 = vmatprep.subr.bf16.mxu1 %v5075_v15 }
  0x4b   :  { %4619 = vmatpush3.bf16.msra.mxu0 %v5076_v19  ;;  %889 = vmatprep.mubr.bf16.mxu0 %v5482_v20 }
  0x4c   :  { %4620 = vmatprep.subr.bf16.mxu0 %v5077_v21  ;;  %953 = vmatmul.mubr.bf16.gmra.mxu1 %v5476_v18 }
  0x4d   :  { %4963 = vmatpush3.bf16.msra.mxu1 %v5076_v19  ;;  %962 = vmatprep.mubr.bf16.mxu1 %v5482_v20 }
  0x4e   :  { %4956 = vmatprep.subr.bf16.mxu1 %v5077_v21 }
  0x4f   :  { %4621 = vmatpush3.bf16.msra.mxu0 %v5078_v24 }
  0x50   :  { %4622 = vmatprep.subr.bf16.mxu0 %v5079_v25 }
  0x51   :  { %4964 = vmatpush3.bf16.msra.mxu1 %v5078_v24 }
  0x52   :  { %890 = vmatmul.mubr.bf16.gmra.mxu0 %v321_v28  ;;  %4957 = vmatprep.subr.bf16.mxu1 %v5079_v25 }
  0x53   :  { %4623 = vmatpush3.bf16.msra.mxu0 %v5080_v29  ;;  %899 = vmatprep.mubr.bf16.mxu0 %v324_v30 }
  0x54   :  { %4624 = vmatprep.subr.bf16.mxu0 %v5081_v31  ;;  %963 = vmatmul.mubr.bf16.gmra.mxu1 %v321_v28 }
  0x55   :  { %4965 = vmatpush3.bf16.msra.mxu1 %v5080_v29  ;;  %972 = vmatprep.mubr.bf16.mxu1 %v324_v30 }
  0x56   :  { %4958 = vmatprep.subr.bf16.mxu1 %v5081_v31 }
  0x57   :  { %4625 = vmatpush3.bf16.msra.mxu0 %v5082_v34 }
  0x58   :  { %4626 = vmatprep.subr.bf16.mxu0 %v5083_v35 }
  0x59   :  { %4966 = vmatpush3.bf16.msra.mxu1 %v5082_v34 }
  0x5a   :  { %900 = vmatmul.mubr.bf16.gmra.mxu0 %v323_v36  ;;  %4959 = vmatprep.subr.bf16.mxu1 %v5083_v35 }
  0x5b   :  { %4627 = vmatpush3.bf16.msra.mxu0 %v5084_v37  ;;  %1015 = vmatprep.mubr.bf16.mxu0 %v5364_v45 }
  0x5c   :  { %4628 = vmatprep.subr.bf16.mxu0 %v5085_v38  ;;  %973 = vmatmul.mubr.bf16.gmra.mxu1 %v323_v36 }
  0x5d   :  { %4967 = vmatpush3.bf16.msra.mxu1 %v5084_v37  ;;  %1039 = vmatprep.mubr.bf16.mxu1 %v324_v30 }
  0x5e   :  { %4960 = vmatprep.subr.bf16.mxu1 %v5085_v38 }
  0x5f   :  { %4629 = vmatpush3.bf16.msra.mxu0 %v5086_v39 }
  0x61   :  { %4968 = vmatpush3.bf16.msra.mxu1 %v5086_v39 }
  0x62   :  { %1016 = vmatmul.mubr.bf16.vlgmr.msra.gmra.mxu0 %v5443_v7 }
  0x63   :  { %1023 = vmatprep.mubr.bf16.mxu0 %v5448_v9 }
  0x64   :  { %1040 = vmatmul.mubr.bf16.vlgmr.msra.gmra.mxu1 %v323_v36 }
  0x65   :  { %4757 = vmatprep.mubr.msk.bf16.mxu1 %vm1137_vm0, %v5087_v47 }
  0x6a   :  { %1024 = vmatmul.mubr.bf16.gmra.mxu0 %v5476_v18 }
  0x6b   :  { %1031 = vmatprep.mubr.bf16.mxu0 %v5482_v20 }
  0x72   :  { %1032 = vmatmul.mubr.bf16.gmra.mxu0 %v321_v28 }
  0x73   :  { %4777 = vmatprep.mubr.msk.bf16.mxu0 %vm1137_vm0, %v5092_v3  ;;  %v5091_v3 = vld [vmem:[%s6788_s2 + $0x60] sm:$0xff]  }
 0x102   :  { %v871_v40 = vpop.f32.mrf.mxu0 }
 0x104   :  { %v873_v41 = vpop.f32.mrf.mxu0  ;;  %v944_v43 = vpop.f32.mrf.mxu1 }
 0x106   :  { %v875_v42 = vpop.f32.mrf.mxu0  ;;  %v5542_v45 = vpop.f32.mrf.mxu1 }
 0x107   :  { %v5552_v57 = vpack.c.bf16 %v875_v42, %v871_v40 }
 0x108   :  { %v877_v44 = vpop.f32.mrf.mxu0  ;;  %v948_v48 = vpop.f32.mrf.mxu1 }
 0x109   :  { %v5568_v9 = vpack.c.bf16 %v877_v44, %v873_v41  ;;  %v5577_v19 = vpack.c.bf16 %v948_v48, %v944_v43 }
 0x10a   :  { %v881_v46 = vpop.f32.mrf.mxu0  ;;  %v950_v50 = vpop.f32.mrf.mxu1 }
 0x10b   :  { %v5600_v33 = vpack.c.bf16 %v950_v50, %v5542_v45 }
 0x10c   :  { %v883_v49 = vpop.f32.mrf.mxu0  ;;  %v954_v53 = vpop.f32.mrf.mxu1 }
 0x10e   :  { %v885_v51 = vpop.f32.mrf.mxu0  ;;  %v956_v55 = vpop.f32.mrf.mxu1 }
 0x10f   :  { %v5548_v52 = vpack.c.bf16 %v885_v51, %v881_v46 }
 0x110   :  { %v887_v54 = vpop.f32.mrf.mxu0  ;;  %v958_v58 = vpop.f32.mrf.mxu1 }
 0x111   :  { %1087 = vrot.lane.b32.xlu0 %v5548_v52, %s5160_s15  ;;  %v5563_v4 = vpack.c.bf16 %v887_v54, %v883_v49  ;;  %v5570_v13 = vpack.c.bf16 %v958_v58, %v954_v53 }
 0x112   :  { %v891_v56 = vpop.f32.mrf.mxu0  ;;  %v960_v60 = vpop.f32.mrf.mxu1 }
 0x113   :  { %v5587_v26 = vpack.c.bf16 %v960_v60, %v956_v55  ;;  %v5088_v60 = vld [vmem:[%s6788_s2 + $0x48] sm:$0xff]  }
 0x114   :  { %v893_v59 = vpop.f32.mrf.mxu0  ;;  %v964_v63 = vpop.f32.mrf.mxu1 }
 0x115   :  { %1085 = vrot.lane.b32.xlu0 %v5552_v57, %s5160_s15 }
 0x116   :  { %v895_v61 = vpop.f32.mrf.mxu0  ;;  %v966_v1 = vpop.f32.mrf.mxu1 }
 0x117   :  { %v5556_v62 = vpack.c.bf16 %v895_v61, %v891_v56  ;;  %v5089_v61 = vld [vmem:[%s6788_s2 + $0x50] sm:$0xff]  }
 0x118   :  { %v897_v0 = vpop.f32.mrf.mxu0  ;;  %v968_v5 = vpop.f32.mrf.mxu1 }
 0x119   :  { %1070 = vrot.lane.b32.xlu0 %v5556_v62, %s5160_s15  ;;  %v5585_v23 = vpack.c.bf16 %v897_v0, %v893_v59  ;;  %v5602_v34 = vpack.c.bf16 %v968_v5, %v964_v63  ;;  %v6799_v0 = vmov 0   ;;  %v75_v5 = vld [vmem:[%s6790_s4 + $0x78] sm:$0xff] }
 0x11a   :  { %v901_v2 = vpop.f32.mrf.mxu0  ;;  %v970_v7 = vpop.f32.mrf.mxu1  ;;  %4974 = vset.pattern.permute.xlu1 %v6799_v0  ;;  %4973 = vset.pattern.permute.xlu0 %v6799_v0 }
 0x11b   :  { %v5620_v45 = vpack.c.bf16 %v970_v7, %v966_v1  ;;  %v59_v1 = vld [vmem:[%s6789_s3 + $0x78] sm:$0xff] }
 0x11c   :  { %v903_v6 = vpop.f32.mrf.mxu0  ;;  %v974_v11 = vpop.f32.mrf.mxu1 }
 0x11d   :  { %1615 = vrot.lane.b32.xlu0 %v5563_v4, %s5160_s15 }
 0x11e   :  { %v905_v8 = vpop.f32.mrf.mxu0  ;;  %v976_v15 = vpop.f32.mrf.mxu1 }
 0x11f   :  { %v1063_v10 = vpack.c.bf16 %v905_v8, %v901_v2  ;;  %v5090_v2 = vld [vmem:[%s6788_s2 + $0x58] sm:$0xff]  }
 0x120   :  { %v907_v12 = vpop.f32.mrf.mxu0  ;;  %v978_v17 = vpop.f32.mrf.mxu1 }
 0x121   :  { %v5572_v14 = vpack.c.bf16 %v907_v12, %v903_v6  ;;  %1613 = vrot.lane.b32.xlu0 %v5568_v9, %s5160_s15  ;;  %1072 = vrot.lane.b32.xlu1 %v1063_v10, %s5160_s15  ;;  %v5593_v27 = vpack.c.bf16 %v978_v17, %v974_v11  ;;  %v74_v6 = vld [vmem:[%s6790_s4 + $0x70] sm:$0xff]  ;;  %v57_v12 = vld [vmem:[%s6789_s3 + $0x68] sm:$0xff] }
 0x122   :  { %v4630_v16 = vpop.f32.mrf.mxu0  ;;  %v980_v21 = vpop.f32.mrf.mxu1 }
 0x123   :  { %v5610_v39 = vpack.c.bf16 %v980_v21, %v976_v15  ;;  %v56_v15 = vld [vmem:[%s6789_s3 + $0x60] sm:$0xff] }
 0x124   :  { %v4631_v18 = vpop.f32.mrf.mxu0  ;;  %v4648_v24 = vpop.f32.mrf.mxu1 }
 0x125   :  { %1997 = vrot.lane.b32.xlu0 %v5570_v13, %s5160_s15  ;;  %1424 = vrot.lane.b32.xlu1 %v5572_v14, %s5160_s15  ;;  %v5583_v20 = vadd.f32 %v4631_v18, %v4630_v16  ;;  %v5094_v18 = vld [vmem:[%s6788_s2 + $0x8] sm:$0xff]  }
 0x126   :  { %v4633_v22 = vpop.f32.mrf.mxu0  ;;  %v4649_v30 = vpop.f32.mrf.mxu1 }
 0x127   :  { %v4650_v46 = vadd.f32 %v4649_v30, %v4648_v24 }
 0x128   :  { %v4634_v25 = vpop.f32.mrf.mxu0  ;;  %v4651_v37 = vpop.f32.mrf.mxu1 }
 0x129   :  { %1995 = vrot.lane.b32.xlu0 %v5577_v19, %s5160_s15  ;;  %1422 = vrot.lane.b32.xlu1 %v5585_v23, %s5160_s15  ;;  %v5595_v28 = vadd.f32 %v4634_v25, %v4633_v22  ;;  %v72_v22 = vld [vmem:[%s6790_s4 + $0x60] sm:$0xff] }
 0x12a   :  { %v4636_v29 = vpop.f32.mrf.mxu0  ;;  %v4652_v42 = vpop.f32.mrf.mxu1 }
 0x12b   :  { %v1052_v31 = vpack.c.bf16 %v5595_v28, %v5583_v20  ;;  %v4653_v47 = vadd.f32 %v4652_v42, %v4651_v37  ;;  %v54_v37 = vld [vmem:[%s6789_s3 + $0x50] sm:$0xff]  ;;  %v5139_v20 = vld [vmem:[%s6788_s2 + $0x1a0] sm:$0xff]  }
 0x12c   :  { %v4637_v32 = vpop.f32.mrf.mxu0  ;;  %v5140_v28 = vld [vmem:[%s6788_s2 + $0x1c0] sm:$0xff]  }
 0x12d   :  { %2379 = vrot.lane.b32.xlu0 %v5587_v26, %s5160_s15  ;;  %1806 = vrot.lane.b32.xlu1 %v5593_v27, %s5160_s15  ;;  %v5608_v35 = vadd.f32 %v4637_v32, %v4636_v29  ;;  %v1067_v51 = vpack.c.bf16 %v4653_v47, %v4650_v46  ;;  %v5095_v29 = vld [vmem:[%s6788_s2 + $0x70] sm:$0xff]   ;;  %v71_v46 = vld [vmem:[%s6790_s4 + $0x58] sm:$0xff] }
 0x12e   :  { %v4639_v36 = vpop.f32.mrf.mxu0  ;;  %v53_v47 = vld [vmem:[%s6789_s3 + $0x48] sm:$0xff] }
 0x130   :  { %v4640_v38 = vpop.f32.mrf.mxu0 }
 0x131   :  { %2377 = vrot.lane.b32.xlu0 %v5600_v33, %s5160_s15  ;;  %1804 = vrot.lane.b32.xlu1 %v5602_v34, %s5160_s15  ;;  %v5616_v40 = vadd.f32 %v4640_v38, %v4639_v36 }
 0x132   :  { %v4642_v41 = vpop.f32.mrf.mxu0 }
 0x133   :  { %v1057_v43 = vpack.c.bf16 %v5616_v40, %v5608_v35  ;;  %v81_v35 = vld [vmem:[%s6792_s7 + $0x8] sm:$0xff]  ;;  %v80_v40 = vld [vmem:[%s6792_s7] sm:$0xff] }
 0x134   :  { %v4643_v44 = vpop.f32.mrf.mxu0 }
 0x135   :  { %2188 = vrot.lane.b32.xlu1 %v5610_v39, %s5160_s15  ;;  %v4644_v50 = vadd.f32 %v4643_v44, %v4642_v41  ;;  %v5098_v41 = vld [vmem:[%s6788_s2 + $0x18] sm:$0xff]   ;;  %v5100_v44 = vld [vmem:[%s6788_s2 + $0x80] sm:$0xff]  }
 0x136   :  { %v4645_v48 = vpop.f32.mrf.mxu0 }
 0x138   :  { %v4646_v49 = vpop.f32.mrf.mxu0 }
 0x139   :  { %2186 = vrot.lane.b32.xlu1 %v5620_v45, %s5160_s15  ;;  %v4647_v53 = vadd.f32 %v4646_v49, %v4645_v48  ;;  %v52_v48 = vld [vmem:[%s6789_s3 + $0x40] sm:$0xff] }
 0x13b   :  { %v1062_v54 = vpack.c.bf16 %v4647_v53, %v4644_v50  ;;  %v5101_v50 = vld [vmem:[%s6788_s2 + $0x28] sm:$0xff]   ;;  %v5103_v53 = vld [vmem:[%s6788_s2 + $0x30] sm:$0xff]  }
 0x13d   :  { %2570 = vrot.lane.b32.xlu1 %v1067_v51, %s5160_s15  ;;  %v5102_v51 = vld [vmem:[%s6788_s2 + $0x88] sm:$0xff]  }
 0x141   :  { %2568 = vrot.lane.b32.xlu1 %v1062_v54, %s5160_s15  ;;  %v5104_v54 = vld [vmem:[%s6788_s2 + $0x90] sm:$0xff]  }
 0x145   :  { %2834 = vperm.xlu1 %4974, %v59_v1   ;;  %v5107_v1 = vld [vmem:[%s6788_s2 + $0xa0] sm:$0xff]  }
 0x149   :  { %2925 = vperm.xlu1 %4974, %v74_v6  }
 0x14d   :  { %2819 = vperm.xlu1 %4974, %v56_v15   ;;  %v65_v15 = vld [vmem:[%s6790_s4 + $0x28] sm:$0xff] }
 0x151   :  { %2915 = vperm.xlu1 %4974, %v72_v22   ;;  %v5115_v22 = vld [vmem:[%s6788_s2 + $0xe0] sm:$0xff]  }
 0x155   :  { %2809 = vperm.xlu1 %4974, %v54_v37   ;;  %v5120_v37 = vld [vmem:[%s6788_s2 + $0x110] sm:$0xff]  }
 0x183   :  { %v1088_v55 = vpop.permute.xlu0 %1087 }
 0x184   :  { %v1095_v56 = vsel %vm1074_vm1, %v1088_v55, %v1063_v10  ;;  %v69_v55 = vld [vmem:[%s6790_s4 + $0x48] sm:$0xff] }
 0x185   :  { %4753 = vmatprep.subr.bf16.mxu1 %v1095_v56 }
 0x186   :  { %4754 = vmatpush3.bf16.msra.mxu1 %v1095_v56  ;;  %v68_v56 = vld [vmem:[%s6790_s4 + $0x40] sm:$0xff] }
 0x187   :  { %v1086_v58 = vpop.permute.xlu0 %1085 }
 0x188   :  { %v1091_v59 = vsel %vm1074_vm1, %v1086_v58, %v5556_v62  ;;  %v58_v62 = vld [vmem:[%s6789_s3 + $0x70] sm:$0xff] }
 0x189   :  { %4755 = vmatprep.subr.bf16.mxu1 %v1091_v59  ;;  %2829 = vperm.xlu0 %4973, %v58_v62  }
 0x18a   :  { %4756 = vmatpush3.bf16.msra.mxu1 %v1091_v59 }
 0x18b   :  { %v1071_v63 = vpop.permute.xlu0 %1070 }
 0x18c   :  { %v1077_v11 = vsel %vm1074_vm1, %v5552_v57, %v1071_v63  ;;  %v5093_v57 = vld [vmem:[%s6788_s2 + $0x68] sm:$0xff]   ;;  %v50_v63 = vld [vmem:[%s6789_s3 + $0x30] sm:$0xff] }
 0x18d   :  { %4758 = vmatmul.mubr.msk.bf16.vlgmr.msra.gmra.mxu1 %vm1137_vm0, %v5088_v60  ;;  %2930 = vperm.xlu0 %4973, %v75_v5   ;;  %v5105_v60 = vld [vmem:[%s6788_s2 + $0x38] sm:$0xff]   ;;  %v5109_v5 = vld [vmem:[%s6788_s2 + $0xa8] sm:$0xff]  }
 0x18e   :  { %4761 = vmatprep.mubr.msk.bf16.mxu1 %vm1137_vm0, %v5089_v61  ;;  %v5106_v61 = vld [vmem:[%s6788_s2 + $0x98] sm:$0xff]  }
 0x18f   :  { %v1616_v7 = vpop.permute.xlu0 %1615 }
 0x190   :  { %v1623_v21 = vsel %vm1074_vm1, %v1616_v7, %v5572_v14  ;;  %v5096_v14 = vld [vmem:[%s6788_s2 + $0x10] sm:$0xff]   ;;  %v5110_v7 = vld [vmem:[%s6788_s2 + $0xc8] sm:$0xff]  }
 0x191   :  { %2824 = vperm.xlu0 %4973, %v57_v12   ;;  %v5112_v12 = vld [vmem:[%s6788_s2 + $0xd0] sm:$0xff]  }
 0x193   :  { %v1073_v8 = vpop.permute.xlu1 %1072  ;;  %v1614_v17 = vpop.permute.xlu0 %1613 }
 0x194   :  { %v1081_v10 = vsel %vm1074_vm1, %v5548_v52, %v1073_v8  ;;  %v1619_v30 = vsel %vm1074_vm1, %v1614_v17, %v5585_v23  ;;  %v5097_v23 = vld [vmem:[%s6788_s2 + $0x78] sm:$0xff]   ;;  %v49_v8 = vld [vmem:[%s6789_s3 + $0x28] sm:$0xff] }
 0x195   :  { %4762 = vmatmul.mubr.msk.bf16.gmra.mxu1 %vm1137_vm0, %v5090_v2  ;;  %4773 = vmatprep.subr.bf16.mxu0 %v1081_v10  ;;  %v5108_v2 = vld [vmem:[%s6788_s2 + $0xc0] sm:$0xff]  }
 0x196   :  { %4774 = vmatpush3.bf16.msra.mxu0 %v1081_v10  ;;  %4765 = vmatprep.mubr.msk.bf16.mxu1 %vm1137_vm0, %v5091_v3  ;;  %v66_v3 = vld [vmem:[%s6790_s4 + $0x30] sm:$0xff]  ;;  %v48_v10 = vld [vmem:[%s6789_s3 + $0x20] sm:$0xff] }
 0x197   :  { %4775 = vmatprep.subr.bf16.mxu0 %v1077_v11  ;;  %v1425_v52 = vpop.permute.xlu1 %1424  ;;  %v1998_v32 = vpop.permute.xlu0 %1997 }
 0x198   :  { %v1432_v16 = vsel %vm1074_vm1, %v5563_v4, %v1425_v52  ;;  %v73_v4 = vld [vmem:[%s6790_s4 + $0x68] sm:$0xff]  ;;  %v5717_v42 = vsel %vm1074_vm1, %v1998_v32, %v5593_v27  ;;  %v70_v27 = vld [vmem:[%s6790_s4 + $0x50] sm:$0xff]  ;;  %v64_v52 = vld [vmem:[%s6790_s4 + $0x20] sm:$0xff] }
 0x199   :  { %4793 = vmatprep.subr.bf16.mxu1 %v1432_v16  ;;  %2920 = vperm.xlu0 %4973, %v73_v4   ;;  %v44_v32 = vld [vmem:[%s6789_s3] sm:$0xff] }
 0x19a   :  { %4776 = vmatpush3.bf16.msra.mxu0 %v1077_v11  ;;  %4794 = vmatpush3.bf16.msra.mxu1 %v1432_v16  ;;  %v5111_v11 = vld [vmem:[%s6788_s2 + $0xb0] sm:$0xff]  }
 0x19b   :  { %v1423_v24 = vpop.permute.xlu1 %1422  ;;  %4813 = vmatprep.subr.bf16.mxu0 %v1623_v21  ;;  %2905 = vperm.xlu1 %4974, %v70_v27   ;;  %v1996_v6 = vpop.permute.xlu0 %1995 }
 0x19c   :  { %v1428_v25 = vsel %vm1074_vm1, %v5568_v9, %v1423_v24  ;;  %v55_v9 = vld [vmem:[%s6789_s3 + $0x58] sm:$0xff]  ;;  %v2001_v16 = vsel %vm1074_vm1, %v1996_v6, %v5602_v34  ;;  %v5116_v24 = vld [vmem:[%s6788_s2 + $0x100] sm:$0xff]  }
 0x19d   :  { %4766 = vmatmul.mubr.msk.bf16.gmra.mxu1 %vm1137_vm0, %v5093_v57  ;;  %4778 = vmatmul.mubr.msk.bf16.vlgmr.msra.gmra.mxu0 %vm1137_vm0, %v5094_v18  ;;  %v5113_v57 = vld [vmem:[%s6788_s2 + $0xb8] sm:$0xff]  }
 0x19e   :  { %4795 = vmatprep.subr.bf16.mxu1 %v1428_v25  ;;  %4814 = vmatpush3.bf16.msra.mxu0 %v1623_v21  ;;  %v5114_v18 = vld [vmem:[%s6788_s2 + $0xd8] sm:$0xff]   ;;  %v46_v21 = vld [vmem:[%s6789_s3 + $0x10] sm:$0xff] }
 0x19f   :  { %4796 = vmatpush3.bf16.msra.mxu1 %v1428_v25  ;;  %v1807_v36 = vpop.permute.xlu1 %1806  ;;  %4815 = vmatprep.subr.bf16.mxu0 %v1619_v30  ;;  %v2380_v17 = vpop.permute.xlu0 %2379  ;;  %v47_v34 = vld [vmem:[%s6789_s3 + $0x18] sm:$0xff]  ;;  %v62_v25 = vld [vmem:[%s6790_s4 + $0x10] sm:$0xff] }
 0x1a0   :  { %v1814_v38 = vsel %vm1074_vm1, %v5570_v13, %v1807_v36  ;;  %4769 = vmatprep.mubr.msk.bf16.mxu1 %vm1137_vm0, %v5095_v29  ;;  %4781 = vmatprep.mubr.msk.bf16.mxu0 %vm1137_vm0, %v5096_v14  ;;  %v5099_v13 = vld [vmem:[%s6788_s2 + $0x20] sm:$0xff]   ;;  %v5844_v4 = vsel %vm1074_vm1, %v2380_v17, %v5610_v39  ;;  %v63_v39 = vld [vmem:[%s6790_s4 + $0x18] sm:$0xff]  ;;  %v5117_v29 = vld [vmem:[%s6788_s2 + $0xe8] sm:$0xff]  }
 0x1a1   :  { %4833 = vmatprep.subr.bf16.mxu1 %v1814_v38  ;;  %2814 = vperm.xlu0 %4973, %v55_v9   ;;  %v45_v9 = vld [vmem:[%s6789_s3 + $0x8] sm:$0xff]  ;;  %v5119_v36 = vld [vmem:[%s6788_s2 + $0xf0] sm:$0xff]   ;;  %v5145_v6 = vld [vmem:[%s6788_s2 + $0x1b8] sm:$0xff]  }
 0x1a2   :  { %4816 = vmatpush3.bf16.msra.mxu0 %v1619_v30  ;;  %2799 = vperm.xlu1 %4974, %v52_v48   ;;  %v5118_v30 = vld [vmem:[%s6788_s2 + $0x108] sm:$0xff]   ;;  %v5124_v48 = vld [vmem:[%s6788_s2 + $0x140] sm:$0xff]   ;;  %v5154_v17 = vld [vmem:[%s6788_s2 + $0x218] sm:$0xff]  }
 0x1a3   :  { %4853 = vmatprep.subr.bf16.mxu0 %v5717_v42  ;;  %v1805_v49 = vpop.permute.xlu1 %1804 }
 0x1a4   :  { %v1810_v58 = vsel %vm1074_vm1, %v5577_v19, %v1805_v49  ;;  %v51_v19 = vld [vmem:[%s6789_s3 + $0x38] sm:$0xff]  ;;  %v5126_v49 = vld [vmem:[%s6788_s2 + $0x148] sm:$0xff]  }
 0x1a5   :  { %4770 = vmatmul.mubr.msk.bf16.gmra.mxu1 %vm1137_vm0, %v5097_v23  ;;  %4782 = vmatmul.mubr.msk.bf16.gmra.mxu0 %vm1137_vm0, %v5098_v41  ;;  %v60_v23 = vld [vmem:[%s6790_s4] sm:$0xff] }
 0x1a6   :  { %4785 = vmatprep.mubr.msk.bf16.mxu0 %vm1137_vm0, %v5099_v13  ;;  %4797 = vmatprep.mubr.msk.bf16.mxu1 %vm1137_vm0, %v5100_v44  ;;  %v5121_v13 = vld [vmem:[%s6788_s2 + $0xf8] sm:$0xff]  }
 0x1a7   :  { %2910 = vperm.xlu0 %4973, %v71_v46   ;;  %v2189_v59 = vpop.permute.xlu1 %2188  ;;  %2895 = vperm.xlu1 %4974, %v68_v56   ;;  %v5122_v44 = vld [vmem:[%s6788_s2 + $0x118] sm:$0xff]   ;;  %v78_v46 = vld [vmem:[%s6791_s6] sm:$0xff] }
 0x1a8   :  { %v5780_v62 = vsel %vm1074_vm1, %v5587_v26, %v2189_v59  ;;  %v67_v26 = vld [vmem:[%s6790_s4 + $0x38] sm:$0xff]  ;;  %v5133_v59 = vld [vmem:[%s6788_s2 + $0x168] sm:$0xff]  }
 0x1a9   :  { %v5130_v56 = vld [vmem:[%s6788_s2 + $0x158] sm:$0xff]  }
 0x1ab   :  { %2804 = vperm.xlu0 %4973, %v53_v47   ;;  %2789 = vperm.xlu1 %4974, %v50_v63   ;;  %v2187_v14 = vpop.permute.xlu1 %2186  ;;  %v5123_v47 = vld [vmem:[%s6788_s2 + $0x120] sm:$0xff]   ;;  %v5136_v63 = vld [vmem:[%s6788_s2 + $0x190] sm:$0xff]  }
 0x1ac   :  { %v2192_v41 = vsel %vm1074_vm1, %v5600_v33, %v2187_v14  ;;  %v79_v33 = vld [vmem:[%s6791_s6 + $0x8] sm:$0xff] }
 0x1ad   :  { %4786 = vmatmul.mubr.msk.bf16.gmra.mxu0 %vm1137_vm0, %v5101_v50  ;;  %4798 = vmatmul.mubr.msk.bf16.vlgmr.msra.gmra.mxu1 %vm1137_vm0, %v5102_v51  ;;  %v5127_v50 = vld [vmem:[%s6788_s2 + $0x130] sm:$0xff]   ;;  %v2378_v51 = vpop.permute.xlu0 %2377 }
 0x1ae   :  { %4834 = vmatpush3.bf16.msra.mxu1 %v1814_v38  ;;  %4789 = vmatprep.mubr.msk.bf16.mxu0 %vm1137_vm0, %v5103_v53  ;;  %v61_v38 = vld [vmem:[%s6790_s4 + $0x8] sm:$0xff]  ;;  %v5128_v53 = vld [vmem:[%s6788_s2 + $0x150] sm:$0xff]  }
 0x1af   :  { %4835 = vmatprep.subr.bf16.mxu1 %v1810_v58  ;;  %4801 = vmatprep.mubr.msk.bf16.mxu1 %vm1137_vm0, %v5104_v54  ;;  %v2383_v54 = vsel %vm1074_vm1, %v2378_v51, %v5620_v45  ;;  %v5132_v45 = vld [vmem:[%s6788_s2 + $0x180] sm:$0xff]  }
 0x1b0   :  { %2900 = vperm.xlu0 %4973, %v69_v55   ;;  %2885 = vperm.xlu1 %4974, %v66_v3   ;;  %v5129_v55 = vld [vmem:[%s6788_s2 + $0x138] sm:$0xff]   ;;  %v5143_v3 = vld [vmem:[%s6788_s2 + $0x1b0] sm:$0xff]  }
 0x1b2   :  { %4836 = vmatpush3.bf16.msra.mxu1 %v1810_v58  ;;  %v5131_v58 = vld [vmem:[%s6788_s2 + $0x160] sm:$0xff]  }
 0x1b3   :  { %4873 = vmatprep.subr.bf16.mxu1 %v5780_v62 }
 0x1b4   :  { %2794 = vperm.xlu0 %4973, %v51_v19   ;;  %2779 = vperm.xlu1 %4974, %v48_v10   ;;  %v5148_v10 = vld [vmem:[%s6788_s2 + $0x200] sm:$0xff]  }
 0x1b5   :  { %4790 = vmatmul.mubr.msk.bf16.gmra.mxu0 %vm1137_vm0, %v5105_v60  ;;  %4802 = vmatmul.mubr.msk.bf16.gmra.mxu1 %vm1137_vm0, %v5106_v61  ;;  %v5134_v60 = vld [vmem:[%s6788_s2 + $0x188] sm:$0xff]   ;;  %v5135_v61 = vld [vmem:[%s6788_s2 + $0x170] sm:$0xff]  }
 0x1b6   :  { %4805 = vmatprep.mubr.msk.bf16.mxu1 %vm1137_vm0, %v5107_v1  ;;  %4817 = vmatprep.mubr.msk.bf16.mxu0 %vm1137_vm0, %v5108_v2  ;;  %v5137_v1 = vld [vmem:[%s6788_s2 + $0x178] sm:$0xff]  }
 0x1b7   :  { %v5138_v2 = vld [vmem:[%s6788_s2 + $0x198] sm:$0xff]  }
 0x1b8   :  { %2890 = vperm.xlu0 %4973, %v67_v26   ;;  %2875 = vperm.xlu1 %4974, %v64_v52   ;;  %v5142_v26 = vld [vmem:[%s6788_s2 + $0x1c8] sm:$0xff]   ;;  %v5152_v52 = vld [vmem:[%s6788_s2 + $0x210] sm:$0xff]  }
 0x1bc   :  { %2784 = vperm.xlu0 %4973, %v49_v8   ;;  %2769 = vperm.xlu1 %4974, %v46_v21   ;;  %v5147_v8 = vld [vmem:[%s6788_s2 + $0x1e0] sm:$0xff]   ;;  %v5158_v21 = vld [vmem:[%s6788_s2 + $0x238] sm:$0xff]  }
 0x1bd   :  { %4806 = vmatmul.mubr.msk.bf16.gmra.mxu1 %vm1137_vm0, %v5109_v5  ;;  %4818 = vmatmul.mubr.msk.bf16.vlgmr.msra.gmra.mxu0 %vm1137_vm0, %v5110_v7  ;;  %v5144_v5 = vld [vmem:[%s6788_s2 + $0x1d0] sm:$0xff]   ;;  %v5146_v7 = vld [vmem:[%s6788_s2 + $0x1d8] sm:$0xff]  }
 0x1be   :  { %4854 = vmatpush3.bf16.msra.mxu0 %v5717_v42  ;;  %4809 = vmatprep.mubr.msk.bf16.mxu1 %vm1137_vm0, %v5111_v11  ;;  %v2571_v42 = vpop.permute.xlu1 %2570  ;;  %v5149_v11 = vld [vmem:[%s6788_s2 + $0x1e8] sm:$0xff]  }
 0x1bf   :  { %4855 = vmatprep.subr.bf16.mxu0 %v2001_v16  ;;  %4821 = vmatprep.mubr.msk.bf16.mxu0 %vm1137_vm0, %v5112_v12  ;;  %v2578_v27 = vsel %vm1074_vm1, %v1057_v43, %v2571_v42  ;;  %v5125_v43 = vld [vmem:[%s6788_s2 + $0x128] sm:$0xff]  }
 0x1c0   :  { %2880 = vperm.xlu0 %4973, %v65_v15   ;;  %2865 = vperm.xlu1 %4974, %v62_v25   ;;  %v5150_v12 = vld [vmem:[%s6788_s2 + $0x208] sm:$0xff]   ;;  %v5151_v15 = vld [vmem:[%s6788_s2 + $0x1f0] sm:$0xff]  }
 0x1c2   :  { %4856 = vmatpush3.bf16.msra.mxu0 %v2001_v16  ;;  %v2569_v19 = vpop.permute.xlu1 %2568  ;;  %v5153_v16 = vld [vmem:[%s6788_s2 + $0x1f8] sm:$0xff]  }
 0x1c3   :  { %4893 = vmatprep.subr.bf16.mxu0 %v5844_v4 }
 0x1c4   :  { %2774 = vperm.xlu0 %4973, %v47_v34   ;;  %2759 = vperm.xlu1 %4974, %v44_v32   ;;  %v5157_v34 = vld [vmem:[%s6788_s2 + $0x230] sm:$0xff]  }
 0x1c5   :  { %4810 = vmatmul.mubr.msk.bf16.gmra.mxu1 %vm1137_vm0, %v5113_v57  ;;  %4822 = vmatmul.mubr.msk.bf16.gmra.mxu0 %vm1137_vm0, %v5114_v18  ;;  %v5155_v57 = vld [vmem:[%s6788_s2 + $0x220] sm:$0xff]   ;;  %v5156_v18 = vld [vmem:[%s6788_s2 + $0x228] sm:$0xff]  }
 0x1c6   :  { %4825 = vmatprep.mubr.msk.bf16.mxu0 %vm1137_vm0, %v5115_v22  ;;  %4837 = vmatprep.mubr.msk.bf16.mxu1 %vm1137_vm0, %v5116_v24 }
 0x1c8   :  { %2870 = vperm.xlu0 %4973, %v63_v39   ;;  %2855 = vperm.xlu1 %4974, %v60_v23  }
 0x1cc   :  { %2764 = vperm.xlu0 %4973, %v45_v9   ;;  %3022 = vperm.xlu1 %4974, %v78_v46  }
 0x1cd   :  { %4826 = vmatmul.mubr.msk.bf16.gmra.mxu0 %vm1137_vm0, %v5117_v29  ;;  %4838 = vmatmul.mubr.msk.bf16.vlgmr.msra.gmra.mxu1 %vm1137_vm0, %v5118_v30 }
 0x1ce   :  { %4874 = vmatpush3.bf16.msra.mxu1 %v5780_v62  ;;  %4829 = vmatprep.mubr.msk.bf16.mxu0 %vm1137_vm0, %v5119_v36  ;;  %v2574_v62 = vsel %vm1074_vm1, %v1052_v31, %v2569_v19  ;;  %v5141_v31 = vld [vmem:[%s6788_s2 + $0x1a8] sm:$0xff]  }
 0x1cf   :  { %4875 = vmatprep.subr.bf16.mxu1 %v2192_v41  ;;  %4841 = vmatprep.mubr.msk.bf16.mxu1 %vm1137_vm0, %v5120_v37 }
 0x1d0   :  { %2860 = vperm.xlu0 %4973, %v61_v38   ;;  %3034 = vperm.xlu1 %4974, %v80_v40  }
 0x1d2   :  { %4876 = vmatpush3.bf16.msra.mxu1 %v2192_v41 }
 0x1d3   :  { %4913 = vmatprep.subr.bf16.mxu1 %v2578_v27 }
 0x1d4   :  { %3027 = vperm.xlu0 %4973, %v79_v33  }
 0x1d5   :  { %4830 = vmatmul.mubr.msk.bf16.gmra.mxu0 %vm1137_vm0, %v5121_v13  ;;  %4842 = vmatmul.mubr.msk.bf16.gmra.mxu1 %vm1137_vm0, %v5122_v44 }
 0x1d6   :  { %4845 = vmatprep.mubr.msk.bf16.mxu1 %vm1137_vm0, %v5123_v47  ;;  %4857 = vmatprep.mubr.msk.bf16.mxu0 %vm1137_vm0, %v5124_v48 }
 0x1d8   :  { %3039 = vperm.xlu0 %4973, %v81_v35  }
 0x1dd   :  { %4846 = vmatmul.mubr.msk.bf16.gmra.mxu1 %vm1137_vm0, %v5125_v43  ;;  %4858 = vmatmul.mubr.msk.bf16.vlgmr.msra.gmra.mxu0 %vm1137_vm0, %v5126_v49 }
 0x1de   :  { %4894 = vmatpush3.bf16.msra.mxu0 %v5844_v4  ;;  %4849 = vmatprep.mubr.msk.bf16.mxu1 %vm1137_vm0, %v5127_v50 }
 0x1df   :  { %4895 = vmatprep.subr.bf16.mxu0 %v2383_v54  ;;  %4861 = vmatprep.mubr.msk.bf16.mxu0 %vm1137_vm0, %v5128_v53 }
 0x1e2   :  { %4896 = vmatpush3.bf16.msra.mxu0 %v2383_v54 }
 0x1e5   :  { %4850 = vmatmul.mubr.msk.bf16.gmra.mxu1 %vm1137_vm0, %v5129_v55  ;;  %4862 = vmatmul.mubr.msk.bf16.gmra.mxu0 %vm1137_vm0, %v5130_v56 }
 0x1e6   :  { %4865 = vmatprep.mubr.msk.bf16.mxu0 %vm1137_vm0, %v5131_v58  ;;  %4877 = vmatprep.mubr.msk.bf16.mxu1 %vm1137_vm0, %v5132_v45 }
 0x1ed   :  { %4866 = vmatmul.mubr.msk.bf16.gmra.mxu0 %vm1137_vm0, %v5133_v59  ;;  %4878 = vmatmul.mubr.msk.bf16.vlgmr.msra.gmra.mxu1 %vm1137_vm0, %v5134_v60 }
 0x1ee   :  { %4914 = vmatpush3.bf16.msra.mxu1 %v2578_v27  ;;  %4869 = vmatprep.mubr.msk.bf16.mxu0 %vm1137_vm0, %v5135_v61 }
 0x1ef   :  { %4915 = vmatprep.subr.bf16.mxu1 %v2574_v62  ;;  %4881 = vmatprep.mubr.msk.bf16.mxu1 %vm1137_vm0, %v5136_v63 }
 0x1f2   :  { %4916 = vmatpush3.bf16.msra.mxu1 %v2574_v62 }
 0x1f5   :  { %4870 = vmatmul.mubr.msk.bf16.gmra.mxu0 %vm1137_vm0, %v5137_v1  ;;  %4882 = vmatmul.mubr.msk.bf16.gmra.mxu1 %vm1137_vm0, %v5138_v2 }
 0x1f6   :  { %4885 = vmatprep.mubr.msk.bf16.mxu1 %vm1137_vm0, %v5139_v20  ;;  %4897 = vmatprep.mubr.msk.bf16.mxu0 %vm1137_vm0, %v5140_v28 }
 0x1fd   :  { %4886 = vmatmul.mubr.msk.bf16.gmra.mxu1 %vm1137_vm0, %v5141_v31  ;;  %4898 = vmatmul.mubr.msk.bf16.vlgmr.msra.gmra.mxu0 %vm1137_vm0, %v5142_v26 }
 0x1fe   :  { %4889 = vmatprep.mubr.msk.bf16.mxu1 %vm1137_vm0, %v5143_v3  ;;  %4901 = vmatprep.mubr.msk.bf16.mxu0 %vm1137_vm0, %v5144_v5  ;;  %v6801_v5 = vmov 0.0  }
 0x1ff   :  { %4933 = vmatprep.subr.bf16.mxu0 %v6801_v5 }
 0x205   :  { %4890 = vmatmul.mubr.msk.bf16.gmra.mxu1 %vm1137_vm0, %v5145_v6  ;;  %4902 = vmatmul.mubr.msk.bf16.gmra.mxu0 %vm1137_vm0, %v5146_v7 }
 0x206   :  { %4905 = vmatprep.mubr.msk.bf16.mxu0 %vm1137_vm0, %v5147_v8  ;;  %4917 = vmatprep.mubr.msk.bf16.mxu1 %vm1137_vm0, %v5148_v10 }
 0x20d   :  { %4906 = vmatmul.mubr.msk.bf16.gmra.mxu0 %vm1137_vm0, %v5149_v11  ;;  %4918 = vmatmul.mubr.msk.bf16.vlgmr.msra.gmra.mxu1 %vm1137_vm0, %v5150_v12 }
 0x20e   :  { %4909 = vmatprep.mubr.msk.bf16.mxu0 %vm1137_vm0, %v5151_v15  ;;  %4921 = vmatprep.mubr.msk.bf16.mxu1 %vm1137_vm0, %v5152_v52 }
 0x215   :  { %4910 = vmatmul.mubr.msk.bf16.gmra.mxu0 %vm1137_vm0, %v5153_v16  ;;  %4922 = vmatmul.mubr.msk.bf16.gmra.mxu1 %vm1137_vm0, %v5154_v17 }
 0x216   :  { %4925 = vmatprep.mubr.msk.bf16.mxu1 %vm1137_vm0, %v5155_v57  ;;  %4949 = vmatprep.mubr.msk.bf16.mxu0 %vm5163_vm2, %v6801_v5 }
 0x21d   :  { %4926 = vmatmul.mubr.msk.bf16.gmra.mxu1 %vm1137_vm0, %v5156_v18 }
 0x21e   :  { %4929 = vmatprep.mubr.msk.bf16.mxu1 %vm1137_vm0, %v5157_v34 }
 0x225   :  { %4930 = vmatmul.mubr.msk.bf16.gmra.mxu1 %vm1137_vm0, %v5158_v21 }
 0x226   :  { %3402 = vmatprep.mubr.bf16.mxu1 %v6799_v0 }
 0x24d   :  { %v4759_v4 = vpop.f32.mrf.mxu1 }
 0x24f   :  { %v1196_v22 = vpop.f32.mrf.mxu1 }
 0x251   :  { %v4760_v24 = vpop.f32.mrf.mxu1 }
 0x253   :  { %v1199_v39 = vpop.f32.mrf.mxu1 }
 0x255   :  { %v4763_v25 = vpop.f32.mrf.mxu1 }
 0x257   :  { %v1212_v29 = vpop.f32.mrf.mxu1 }
 0x259   :  { %v4764_v14 = vpop.f32.mrf.mxu1 }
 0x25b   :  { %v1215_v30 = vpop.f32.mrf.mxu1 }
 0x25d   :  { %v4767_v9 = vpop.f32.mrf.mxu1  ;;  %v4779_v32 = vpop.f32.mrf.mxu0 }
 0x25e   :  { %v1366_v36 = vadd.f32 %v4779_v32, %v4759_v4 }
 0x25f   :  { %v1228_v37 = vpop.f32.mrf.mxu1  ;;  %v1357_v38 = vpop.f32.mrf.mxu0 }
 0x260   :  { %v1358_v23 = vadd.f32 %v1357_v38, %v1196_v22 }
 0x261   :  { %v4768_v41 = vpop.f32.mrf.mxu1  ;;  %v4780_v42 = vpop.f32.mrf.mxu0 }
 0x262   :  { %v1369_v13 = vadd.f32 %v4780_v42, %v4760_v24  ;;  %v6071_v24 = vpop.permute.xlu1 %2834 }
 0x263   :  { %v1231_v44 = vpop.f32.mrf.mxu1  ;;  %v1360_v33 = vpop.f32.mrf.mxu0  ;;  %6812 = vst [vmem:[#allocation3_spill] sm:$0xff] %v6071_v24 }
 0x264   :  { %v1361_v46 = vadd.f32 %v1360_v33, %v1199_v39 }
 0x265   :  { %v4771_v27 = vpop.f32.mrf.mxu1  ;;  %v4783_v47 = vpop.f32.mrf.mxu0 }
 0x266   :  { %v1382_v48 = vadd.f32 %v4783_v47, %v4763_v25 }
 0x267   :  { %v1244_v35 = vpop.f32.mrf.mxu1  ;;  %v1373_v40 = vpop.f32.mrf.mxu0 }
 0x268   :  { %v1374_v43 = vadd.f32 %v1373_v40, %v1212_v29 }
 0x269   :  { %v4772_v49 = vpop.f32.mrf.mxu1  ;;  %v4784_v50 = vpop.f32.mrf.mxu0 }
 0x26a   :  { %v1385_v51 = vadd.f32 %v4784_v50, %v4764_v14 }
 0x26b   :  { %v1247_v53 = vpop.f32.mrf.mxu1  ;;  %v1376_v54 = vpop.f32.mrf.mxu0 }
 0x26c   :  { %v1377_v55 = vadd.f32 %v1376_v54, %v1215_v30  ;;  %v6073_v30 = vpop.permute.xlu0 %2829 }
 0x26d   :  { %v4787_v56 = vpop.f32.mrf.mxu0  ;;  %v4799_v58 = vpop.f32.mrf.mxu1  ;;  %6813 = vst [vmem:[#allocation4_spill] sm:$0xff] %v6073_v30 }
 0x26e   :  { %v1398_v45 = vadd.f32 %v4787_v56, %v4767_v9  ;;  %v1597_v59 = vadd.f32 %v4799_v58, %v1366_v36 }
 0x26f   :  { %v1389_v60 = vpop.f32.mrf.mxu0  ;;  %v1532_v61 = vpop.f32.mrf.mxu1 }
 0x270   :  { %v1390_v19 = vadd.f32 %v1389_v60, %v1228_v37  ;;  %v1595_v63 = vadd.f32 %v1532_v61, %v1358_v23  ;;  %v6077_v47 = vpop.permute.xlu0 %2930 }
 0x271   :  { %v4788_v62 = vpop.f32.mrf.mxu0  ;;  %v4800_v1 = vpop.f32.mrf.mxu1  ;;  %6815 = vst [vmem:[#allocation6_spill] sm:$0xff] %v6077_v47 }
 0x272   :  { %v1401_v2 = vadd.f32 %v4788_v62, %v4768_v41  ;;  %v1598_v20 = vadd.f32 %v4800_v1, %v1369_v13  ;;  %v6075_v13 = vpop.permute.xlu1 %2925 }
 0x273   :  { %v1392_v28 = vpop.f32.mrf.mxu0  ;;  %v1535_v31 = vpop.f32.mrf.mxu1  ;;  %6814 = vst [vmem:[#allocation5_spill] sm:$0xff] %v6075_v13 }
 0x274   :  { %v1393_v26 = vadd.f32 %v1392_v28, %v1231_v44  ;;  %v1596_v3 = vadd.f32 %v1535_v31, %v1361_v46 }
 0x275   :  { %v4791_v6 = vpop.f32.mrf.mxu0  ;;  %v4803_v7 = vpop.f32.mrf.mxu1 }
 0x276   :  { %v1414_v8 = vadd.f32 %v4791_v6, %v4771_v27  ;;  %v1601_v10 = vadd.f32 %v4803_v7, %v1382_v48  ;;  %v6083_v54 = vpop.permute.xlu1 %2819 }
 0x277   :  { %v1405_v11 = vpop.f32.mrf.mxu0  ;;  %v1548_v12 = vpop.f32.mrf.mxu1  ;;  %6816 = vst [vmem:[#allocation7_spill] sm:$0xff] %v6083_v54 }
 0x278   :  { %v1406_v15 = vadd.f32 %v1405_v11, %v1244_v35  ;;  %v1599_v52 = vadd.f32 %v1548_v12, %v1374_v43 }
 0x279   :  { %v4792_v16 = vpop.f32.mrf.mxu0  ;;  %v4804_v17 = vpop.f32.mrf.mxu1 }
 0x27a   :  { %v1417_v57 = vadd.f32 %v4792_v16, %v4772_v49  ;;  %v1602_v18 = vadd.f32 %v4804_v17, %v1385_v51  ;;  %v6091_v28 = vpop.permute.xlu1 %2915 }
 0x27b   :  { %v1408_v34 = vpop.f32.mrf.mxu0  ;;  %v1551_v21 = vpop.f32.mrf.mxu1  ;;  %6818 = vst [vmem:[#allocation9_spill] sm:$0xff] %v6091_v28 }
 0x27c   :  { %v1409_v4 = vadd.f32 %v1408_v34, %v1247_v53  ;;  %v1600_v22 = vadd.f32 %v1551_v21, %v1377_v55  ;;  %v138_v34 = vld [vmem:[%s6794_s8 + $0x1c0] sm:$0xff] }
 0x27d   :  { %v4807_v39 = vpop.f32.mrf.mxu1  ;;  %v4819_v25 = vpop.f32.mrf.mxu0 }
 0x27e   :  { %v1605_v29 = vadd.f32 %v4807_v39, %v1398_v45  ;;  %v1788_v14 = vadd.f32 %v4819_v25, %v1597_v59  ;;  %v6087_v59 = vpop.permute.xlu0 %2824 }
 0x27f   :  { %v1564_v9 = vpop.f32.mrf.mxu1  ;;  %v1723_v32 = vpop.f32.mrf.mxu0  ;;  %6817 = vst [vmem:[#allocation8_spill] sm:$0xff] %v6087_v59 }
 0x280   :  { %v1603_v36 = vadd.f32 %v1564_v9, %v1390_v19  ;;  %v1786_v37 = vadd.f32 %v1723_v32, %v1595_v63 }
 0x281   :  { %v4808_v38 = vpop.f32.mrf.mxu1  ;;  %v4820_v23 = vpop.f32.mrf.mxu0 }
 0x282   :  { %v1606_v41 = vadd.f32 %v4808_v38, %v1401_v2  ;;  %v1789_v42 = vadd.f32 %v4820_v23, %v1598_v20  ;;  %v6093_v7 = vpop.permute.xlu0 %2920 }
 0x283   :  { %v1567_v44 = vpop.f32.mrf.mxu1  ;;  %v1726_v33 = vpop.f32.mrf.mxu0  ;;  %6819 = vst [vmem:[#allocation10_spill] sm:$0xff] %v6093_v7 }
 0x284   :  { %v1604_v46 = vadd.f32 %v1567_v44, %v1393_v26  ;;  %v1787_v27 = vadd.f32 %v1726_v33, %v1596_v3 }
 0x285   :  { %v4811_v48 = vpop.f32.mrf.mxu1  ;;  %v4823_v35 = vpop.f32.mrf.mxu0 }
 0x286   :  { %v6079_v40 = vadd.f32 %v4811_v48, %v1414_v8  ;;  %v1792_v43 = vadd.f32 %v4823_v35, %v1601_v10 }
 0x287   :  { %v1580_v49 = vpop.f32.mrf.mxu1  ;;  %v1739_v50 = vpop.f32.mrf.mxu0 }
 0x288   :  { %v6081_v51 = vadd.f32 %v1580_v49, %v1406_v15  ;;  %v1790_v53 = vadd.f32 %v1739_v50, %v1599_v52 }
 0x289   :  { %v4812_v55 = vpop.f32.mrf.mxu1  ;;  %v4824_v56 = vpop.f32.mrf.mxu0 }
 0x28a   :  { %v6085_v58 = vadd.f32 %v4812_v55, %v1417_v57  ;;  %v1793_v45 = vadd.f32 %v4824_v56, %v1602_v18  ;;  %v6096_v57 = vpop.permute.xlu1 %2809  ;;  %v130_v18 = vld [vmem:[%s6794_s8 + $0x180] sm:$0xff] }
 0x28b   :  { %v1583_v60 = vpop.f32.mrf.mxu1  ;;  %v1742_v61 = vpop.f32.mrf.mxu0  ;;  %6820 = vst [vmem:[#allocation11_spill] sm:$0xff] %v6096_v57  ;;  %v6108_v39 = vcombine.high %v130_v18, %v138_v34 }
 0x28c   :  { %v6089_v19 = vadd.f32 %v1583_v60, %v1409_v4  ;;  %v1791_v63 = vadd.f32 %v1742_v61, %v1600_v22  ;;  %v6106_v22 = vcombine.low %v130_v18, %v138_v34 }
 0x28d   :  { %v4827_v62 = vpop.f32.mrf.mxu0  ;;  %v4839_v1 = vpop.f32.mrf.mxu1  ;;  %6822 = vst [vmem:[#allocation13_spill] sm:$0xff] %v6108_v39  ;;  %3378 = vmatprep.subr.bf16.mxu1 %v6108_v39 }
 0x28e   :  { %v1796_v2 = vadd.f32 %v4827_v62, %v1605_v29  ;;  %v1979_v20 = vadd.f32 %v4839_v1, %v1788_v14  ;;  %6821 = vst [vmem:[#allocation12_spill] sm:$0xff] %v6106_v22  ;;  %v6110_v29 = vpop.permute.xlu0 %2814  ;;  %3379 = vmatpush1.bf16.msra.mxu1 %v6106_v22  ;;  %v6120_v23 = vpop.permute.xlu1 %2905 }
 0x28f   :  { %v1755_v31 = vpop.f32.mrf.mxu0  ;;  %v1914_v26 = vpop.f32.mrf.mxu1  ;;  %6823 = vst [vmem:[#allocation14_spill] sm:$0xff] %v6110_v29  ;;  %6824 = vst [vmem:[#allocation15_spill] sm:$0xff] %v6120_v23 }
 0x290   :  { %v1794_v3 = vadd.f32 %v1755_v31, %v1603_v36  ;;  %v1977_v6 = vadd.f32 %v1914_v26, %v1786_v37 }
 0x291   :  { %v4828_v8 = vpop.f32.mrf.mxu0  ;;  %v4840_v10 = vpop.f32.mrf.mxu1 }
 0x292   :  { %v1797_v11 = vadd.f32 %v4828_v8, %v1606_v41  ;;  %v1980_v12 = vadd.f32 %v4840_v10, %v1789_v42  ;;  %v6126_v33 = vpop.permute.xlu0 %2910  ;;  %v6132_v55 = vpop.permute.xlu1 %2799 }
 0x293   :  { %v1758_v15 = vpop.f32.mrf.mxu0  ;;  %v1917_v52 = vpop.f32.mrf.mxu1  ;;  %6825 = vst [vmem:[#allocation16_spill] sm:$0xff] %v6126_v33  ;;  %6826 = vst [vmem:[#allocation17_spill] sm:$0xff] %v6132_v55 }
 0x294   :  { %v1795_v16 = vadd.f32 %v1758_v15, %v1604_v46  ;;  %v1978_v17 = vadd.f32 %v1917_v52, %v1787_v27 }
 0x295   :  { %v6104_v21 = vpop.f32.mrf.mxu0  ;;  %v4843_v4 = vpop.f32.mrf.mxu1 }
 0x296   :  { %v1983_v25 = vadd.f32 %v4843_v4, %v1792_v43  ;;  %v6142_v8 = vpop.permute.xlu1 %2895 }
 0x297   :  { %v6112_v14 = vpop.f32.mrf.mxu0  ;;  %v1930_v9 = vpop.f32.mrf.mxu1  ;;  %6829 = vst [vmem:[#allocation20_spill] sm:$0xff] %v6142_v8 }
 0x298   :  { %v1981_v32 = vadd.f32 %v1930_v9, %v1790_v53 }
 0x299   :  { %v6116_v36 = vpop.f32.mrf.mxu0  ;;  %v4844_v37 = vpop.f32.mrf.mxu1 }
 0x29a   :  { %v6118_v38 = vadd.f32 %v4844_v37, %v1793_v45 }
 0x29b   :  { %v6122_v41 = vpop.f32.mrf.mxu0  ;;  %v1933_v42 = vpop.f32.mrf.mxu1 }
 0x29c   :  { %v6124_v44 = vadd.f32 %v1933_v42, %v1791_v63  ;;  %v6136_v63 = vpop.permute.xlu0 %2804 }
 0x29d   :  { %v4847_v46 = vpop.f32.mrf.mxu1  ;;  %v4859_v27 = vpop.f32.mrf.mxu0  ;;  %6827 = vst [vmem:[#allocation18_spill] sm:$0xff] %v6136_v63 }
 0x29e   :  { %v6128_v48 = vadd.f32 %v4847_v46, %v1796_v2  ;;  %v2170_v35 = vadd.f32 %v4859_v27, %v1979_v20 }
 0x29f   :  { %v1946_v43 = vpop.f32.mrf.mxu1  ;;  %v2105_v49 = vpop.f32.mrf.mxu0 }
 0x2a0   :  { %v6130_v50 = vadd.f32 %v1946_v43, %v1794_v3  ;;  %v2168_v53 = vadd.f32 %v2105_v49, %v1977_v6 }
 0x2a1   :  { %v4848_v56 = vpop.f32.mrf.mxu1  ;;  %v4860_v45 = vpop.f32.mrf.mxu0 }
 0x2a2   :  { %v6134_v60 = vadd.f32 %v4848_v56, %v1797_v11  ;;  %v2171_v61 = vadd.f32 %v4860_v45, %v1980_v12  ;;  %v6146_v11 = vpop.permute.xlu0 %2900 }
 0x2a3   :  { %v1949_v62 = vpop.f32.mrf.mxu1  ;;  %v2108_v1 = vpop.f32.mrf.mxu0  ;;  %6830 = vst [vmem:[#allocation21_spill] sm:$0xff] %v6146_v11 }
 0x2a4   :  { %v6138_v31 = vadd.f32 %v1949_v62, %v1795_v16  ;;  %v2169_v2 = vadd.f32 %v2108_v1, %v1978_v17  ;;  %v6156_v17 = vpop.permute.xlu1 %2789 }
 0x2a5   :  { %v6140_v20 = vpop.f32.mrf.mxu1  ;;  %v4863_v26 = vpop.f32.mrf.mxu0 }
 0x2a6   :  { %6828 = vst [vmem:[#allocation19_spill] sm:$0xff] %v6138_v31  ;;  %v2174_v3 = vadd.f32 %v4863_v26, %v1983_v25  ;;  %v6160_v9 = vpop.permute.xlu0 %2794 }
 0x2a7   :  { %v6144_v6 = vpop.f32.mrf.mxu1  ;;  %v2121_v10 = vpop.f32.mrf.mxu0 }
 0x2a8   :  { %v2172_v15 = vadd.f32 %v2121_v10, %v1981_v32  ;;  %v6166_v49 = vpop.permute.xlu1 %2885 }
 0x2a9   :  { %v6148_v12 = vpop.f32.mrf.mxu1  ;;  %v6150_v52 = vpop.f32.mrf.mxu0 }
 0x2aa   :  { %v6170_v1 = vpop.permute.xlu0 %2890 }
 0x2ab   :  { %v6152_v18 = vpop.f32.mrf.mxu1  ;;  %v6154_v16 = vpop.f32.mrf.mxu0  ;;  %6832 = vst [vmem:[#allocation23_spill] sm:$0xff] %v6170_v1 }
 0x2ad   :  { %v6158_v34 = vpop.f32.mrf.mxu0  ;;  %v4879_v4 = vpop.f32.mrf.mxu1 }
 0x2ae   :  { %v2361_v25 = vadd.f32 %v4879_v4, %v2170_v35 }
 0x2af   :  { %v6162_v37 = vpop.f32.mrf.mxu0  ;;  %v2296_v32 = vpop.f32.mrf.mxu1 }
 0x2b0   :  { %v2359_v42 = vadd.f32 %v2296_v32, %v2168_v53  ;;  %v6176_v32 = vpop.permute.xlu1 %2779 }
 0x2b1   :  { %v6164_v46 = vpop.f32.mrf.mxu0  ;;  %v4880_v27 = vpop.f32.mrf.mxu1 }
 0x2b2   :  { %v2362_v43 = vadd.f32 %v4880_v27, %v2171_v61  ;;  %v6182_v27 = vpop.permute.xlu0 %2784 }
 0x2b3   :  { %v6168_v56 = vpop.f32.mrf.mxu0  ;;  %v2299_v45 = vpop.f32.mrf.mxu1  ;;  %6836 = vst [vmem:[#allocation27_spill] sm:$0xff] %v6182_v27  ;;  %v1800_v27 = vadd.f32 %v6104_v21, %v6079_v40 }
 0x2b4   :  { %6831 = vst [vmem:[#allocation22_spill] sm:$0xff] %v6168_v56  ;;  %v2360_v62 = vadd.f32 %v2299_v45, %v2169_v2 }
 0x2b5   :  { %v6172_v26 = vpop.f32.mrf.mxu0  ;;  %v4883_v35 = vpop.f32.mrf.mxu1 }
 0x2b6   :  { %6833 = vst [vmem:[#allocation24_spill] sm:$0xff] %v6172_v26  ;;  %v2365_v10 = vadd.f32 %v4883_v35, %v2174_v3  ;;  %v6190_v3 = vpop.permute.xlu1 %2875 }
 0x2b7   :  { %v6174_v4 = vpop.f32.mrf.mxu0  ;;  %v2312_v0 = vpop.f32.mrf.mxu1 }
 0x2b8   :  { %6834 = vst [vmem:[#allocation25_spill] sm:$0xff] %v6174_v4  ;;  %v2363_v53 = vadd.f32 %v2312_v0, %v2172_v15  ;;  %v6194_v15 = vpop.permute.xlu0 %2880 }
 0x2b9   :  { %v6178_v5 = vpop.f32.mrf.mxu0  ;;  %v6180_v61 = vpop.f32.mrf.mxu1  ;;  %6838 = vst [vmem:[#allocation29_spill] sm:$0xff] %v6194_v15 }
 0x2ba   :  { %6835 = vst [vmem:[#allocation26_spill] sm:$0xff] %v6178_v5  ;;  %v2770_v24 = vpop.permute.xlu1 %2769 }
 0x2bb   :  { %v6184_v22 = vpop.f32.mrf.mxu0  ;;  %v6186_v2 = vpop.f32.mrf.mxu1 }
 0x2bc   :  { %6837 = vst [vmem:[#allocation28_spill] sm:$0xff] %v6184_v22  ;;  %v2775_v11 = vpop.permute.xlu0 %2774 }
 0x2bd   :  { %v6188_v45 = vpop.f32.mrf.mxu1  ;;  %v4899_v39 = vpop.f32.mrf.mxu0 }
 0x2be   :  { %v2866_v22 = vpop.permute.xlu1 %2865  ;;  %v2552_v55 = vadd.f32 %v4899_v39, %v2361_v25  ;;  %v1798_v39 = vadd.f32 %v6112_v14, %v6081_v51  ;;  %v2175_v14 = vadd.f32 %v6150_v52, %v6118_v38 }
 0x2bf   :  { %v6192_v35 = vpop.f32.mrf.mxu1  ;;  %v2487_v0 = vpop.f32.mrf.mxu0 }
 0x2c0   :  { %v2871_v5 = vpop.permute.xlu0 %2870  ;;  %v2550_v15 = vadd.f32 %v2487_v0, %v2359_v42  ;;  %v1801_v42 = vadd.f32 %v6116_v36, %v6085_v58  ;;  %v1989_v21 = vadd.f32 %v6144_v6, %v1798_v39 }
 0x2c1   :  { %v6196_v7 = vpop.f32.mrf.mxu1  ;;  %v4900_v59 = vpop.f32.mrf.mxu0 }
 0x2c2   :  { %v2553_v26 = vadd.f32 %v4900_v59, %v2362_v43  ;;  %v1992_v51 = vadd.f32 %v6148_v12, %v1801_v42 }
 0x2c3   :  { %v6198_v47 = vpop.f32.mrf.mxu1  ;;  %v2490_v28 = vpop.f32.mrf.mxu0 }
 0x2c4   :  { %6839 = vst [vmem:[#allocation30_spill] sm:$0xff] %v6198_v47  ;;  %v2765_v25 = vpop.permute.xlu0 %2764 }
 0x2c5   :  { %v6200_v13 = vpop.f32.mrf.mxu1  ;;  %v4903_v54 = vpop.f32.mrf.mxu0 }
 0x2c6   :  { %6840 = vst [vmem:[#allocation31_spill] sm:$0xff] %v6200_v13 }
 0x2c7   :  { %v6202_v30 = vpop.f32.mrf.mxu1  ;;  %v2503_v63 = vpop.f32.mrf.mxu0 }
 0x2c8   :  { %6841 = vst [vmem:[#allocation32_spill] sm:$0xff] %v6202_v30  ;;  %v2760_v30 = vpop.permute.xlu1 %2759  ;;  %v2861_v12 = vpop.permute.xlu0 %2860 }
 0x2c9   :  { %v6204_v8 = vpop.f32.mrf.mxu1  ;;  %v4904_v33 = vpop.f32.mrf.mxu0 }
 0x2ca   :  { %6842 = vst [vmem:[#allocation33_spill] sm:$0xff] %v6204_v8 }
 0x2cb   :  { %v6206_v29 = vpop.f32.mrf.mxu1  ;;  %v2506_v23 = vpop.f32.mrf.mxu0 }
 0x2cc   :  { %6843 = vst [vmem:[#allocation34_spill] sm:$0xff] %v6206_v29 }
 0x2cd   :  { %v6208_v57 = vpop.f32.mrf.mxu0  ;;  %v4919_v47 = vpop.f32.mrf.mxu1 }
 0x2ce   :  { %v2743_v1 = vadd.f32 %v4919_v47, %v2552_v55  ;;  %v1799_v47 = vadd.f32 %v6122_v41, %v6089_v19  ;;  %v2551_v55 = vadd.f32 %v2490_v28, %v2360_v62  ;;  %v2173_v19 = vadd.f32 %v6154_v16, %v6124_v44 }
 0x2cf   :  { %v6210_v13 = vpop.f32.mrf.mxu0  ;;  %v2678_v4 = vpop.f32.mrf.mxu1  ;;  %v2554_v28 = vadd.f32 %v2503_v63, %v2363_v53  ;;  %v2176_v44 = vadd.f32 %v6162_v37, %v6130_v50  ;;  %v2179_v53 = vadd.f32 %v6164_v46, %v6134_v60 }
 0x2d0   :  { %v2839_v56 = vmul.f32 %v2770_v24, %v2743_v1  ;;  %v2741_v31 = vadd.f32 %v2678_v4, %v2550_v15  ;;  %v1991_v1 = vadd.f32 %v6140_v20, %v1800_v27  ;;  %v2556_v4 = vadd.f32 %v4903_v54, %v2365_v10 }
 0x2d1   :  { %v4920_v8 = vpop.f32.mrf.mxu1  ;;  %v4908_v59 = vpop.f32.mrf.mxu0  ;;  %v2178_v54 = vadd.f32 %v6158_v34, %v6128_v48  ;;  %v2364_v38 = vadd.f32 %v6186_v2, %v2173_v19 }
 0x2d2   :  { %v2744_v29 = vadd.f32 %v4920_v8, %v2553_v26  ;;  %v2837_v43 = vmul.f32 %v2760_v30, %v2741_v31  ;;  %v2935_v0 = vadd.f32 %v2866_v22, %v2839_v56  ;;  %v2856_v30 = vpop.permute.xlu1 %2855  ;;  %v2366_v22 = vadd.f32 %v6180_v61, %v2175_v14  ;;  %v6849_v14 = vld [vmem:[#allocation23_spill] sm:$0xff] }
 0x2d3   :  { %v2681_v24 = vpop.f32.mrf.mxu1  ;;  %v2522_v20 = vpop.f32.mrf.mxu0  ;;  %v2369_v34 = vadd.f32 %v6188_v45, %v2178_v54  ;;  %v2555_v62 = vadd.f32 %v2506_v23, %v2364_v38  ;;  %v2370_v23 = vadd.f32 %v6196_v7, %v2179_v53  ;;  %v6848_v7 = vld [vmem:[#allocation25_spill] sm:$0xff] }
 0x2d4   :  { %v2840_v40 = vmul.f32 %v2775_v11, %v2744_v29  ;;  %v2742_v58 = vadd.f32 %v2681_v24, %v2551_v55  ;;  %v2933_v29 = vadd.f32 %v2856_v30, %v2837_v43  ;;  %v2951_v11 = vmax.f32 %v2935_v0, 0.0  ;;  %v6844_v55 = vld [vmem:[#allocation27_spill] sm:$0xff]  ;;  %v6846_v43 = vld [vmem:[#allocation22_spill] sm:$0xff]  ;;  %v6847_v24 = vld [vmem:[#allocation24_spill] sm:$0xff] }
 0x2d5   :  { %v4923_v36 = vpop.f32.mrf.mxu1  ;;  %v4911_v2 = vpop.f32.mrf.mxu0  ;;  %v2560_v37 = vadd.f32 %v6208_v57, %v2369_v34  ;;  %v2180_v0 = vadd.f32 %v6848_v7, %v1989_v21  ;;  %v6852_v30 = vld [vmem:[#allocation26_spill] sm:$0xff]  ;;  %v6857_v34 = vld [vmem:[#allocation15_spill] sm:$0xff]  ;;  %v6866_v7 = vld [vmem:[#allocation21_spill] sm:$0xff] }
 0x2d6   :  { %v2936_v41 = vadd.f32 %v2871_v5, %v2840_v40  ;;  %v2747_v31 = vadd.f32 %v4923_v36, %v2556_v4  ;;  %v2838_v8 = vmul.f32 %v2765_v25, %v2742_v58  ;;  %v2557_v5 = vadd.f32 %v4904_v33, %v2366_v22  ;;  %v6850_v36 = vld [vmem:[#allocation29_spill] sm:$0xff] }
 0x2d7   :  { %v2694_v6 = vpop.f32.mrf.mxu1  ;;  %v2949_v61 = vmax.f32 %v2933_v29, 0.0  ;;  %v1990_v33 = vadd.f32 %v6152_v18, %v1799_v47  ;;  %v2182_v4 = vadd.f32 %v6847_v24, %v1991_v1  ;;  %v2535_v40 = vpop.f32.mrf.mxu0  ;;  %v6854_v1 = vld [vmem:[#allocation31_spill] sm:$0xff] }
 0x2d8   :  { %v2952_v52 = vmax.f32 %v2936_v41, 0.0  ;;  %v2745_v56 = vadd.f32 %v2694_v6, %v2554_v28  ;;  %v2934_v63 = vadd.f32 %v2861_v12, %v2838_v8  ;;  %v2843_v16 = vmul.f32 %v6156_v17, %v2747_v31  ;;  %v6853_v31 = vld [vmem:[#allocation30_spill] sm:$0xff]  ;;  %v6855_v12 = vld [vmem:[#allocation32_spill] sm:$0xff] }
 0x2d9   :  { %v4924_v48 = vpop.f32.mrf.mxu1  ;;  %v2367_v17 = vadd.f32 %v6192_v35, %v2176_v44  ;;  %v6845_v35 = vld [vmem:[#allocation19_spill] sm:$0xff]  ;;  %v2183_v41 = vadd.f32 %v6852_v30, %v1992_v51  ;;  %v2373_v6 = vadd.f32 %v6854_v1, %v2182_v4  ;;  %v6871_v1 = vld [vmem:[#allocation6_spill] sm:$0xff] }
 0x2da   :  { %v6235_v26 = vpack.c.bf16 %v2952_v52, %v2951_v11  ;;  %v2841_v10 = vmul.f32 %v6176_v32, %v2745_v56  ;;  %v2950_v27 = vmax.f32 %v2934_v63, 0.0  ;;  %v2748_v15 = vadd.f32 %v4924_v48, %v2557_v5  ;;  %v4912_v56 = vpop.f32.mrf.mxu0  ;;  %v6856_v5 = vld [vmem:[#allocation17_spill] sm:$0xff] }
 0x2db   :  { %v2697_v50 = vpop.f32.mrf.mxu1  ;;  %v2939_v32 = vadd.f32 %v6166_v49, %v2843_v16  ;;  %v2558_v25 = vadd.f32 %v6210_v13, %v2367_v17  ;;  %v2177_v57 = vadd.f32 %v6846_v43, %v6845_v35  ;;  %v6851_v13 = vld [vmem:[#allocation11_spill] sm:$0xff]  ;;  %v2371_v52 = vadd.f32 %v6855_v12, %v2180_v0 }
 0x2dc   :  { %v2746_v45 = vadd.f32 %v2697_v50, %v2555_v62  ;;  %v6244_v39 = vpack.c.bf16 %v2950_v27, %v2949_v61  ;;  %v2844_v60 = vmul.f32 %v6160_v9, %v2748_v15  ;;  %v2937_v42 = vadd.f32 %v6190_v3, %v2841_v10  ;;  %v6858_v10 = vld [vmem:[#allocation14_spill] sm:$0xff]  ;;  %v6859_v61 = vld [vmem:[#allocation28_spill] sm:$0xff]  ;;  %v6860_v15 = vld [vmem:[#allocation33_spill] sm:$0xff] }
 0x2dd   :  { %v4927_v46 = vpop.f32.mrf.mxu1  ;;  %v2561_v9 = vadd.f32 %v4908_v59, %v2370_v23  ;;  %v2368_v54 = vadd.f32 %v6853_v31, %v2177_v57  ;;  %v2955_v22 = vmax.f32 %v2939_v32, 0.0  ;;  %v2564_v48 = vadd.f32 %v4911_v2, %v2373_v6  ;;  %v6861_v23 = vld [vmem:[#allocation16_spill] sm:$0xff] }
 0x2de   :  { %v2842_v18 = vmul.f32 %v6844_v55, %v2746_v45  ;;  %v2751_v47 = vadd.f32 %v4927_v46, %v2560_v37  ;;  %v2940_v49 = vadd.f32 %v6849_v14, %v2844_v60  ;;  %v2953_v21 = vmax.f32 %v2937_v42, 0.0  ;;  %v6862_v60 = vld [vmem:[#allocation34_spill] sm:$0xff]  ;;  %v2538_v42 = vpop.f32.mrf.mxu0  ;;  %v6863_v2 = vld [vmem:[#allocation20_spill] sm:$0xff] }
 0x2df   :  { %v2710_v58 = vpop.f32.mrf.mxu1  ;;  %v2559_v59 = vadd.f32 %v2522_v20, %v2368_v54  ;;  %v2181_v27 = vadd.f32 %v6859_v61, %v1990_v33  ;;  %v2374_v50 = vadd.f32 %v6860_v15, %v2183_v41  ;;  %v2562_v45 = vadd.f32 %v2535_v40, %v2371_v52  ;;  %v6865_v33 = vld [vmem:[#allocation4_spill] sm:$0xff]  ;;  %v6869_v41 = vld [vmem:[#allocation3_spill] sm:$0xff]  ;;  %v6873_v52 = vld [vmem:[#allocation10_spill] sm:$0xff] }
 0x2e0   :  { %v2938_v19 = vadd.f32 %v6850_v36, %v2842_v18  ;;  %v2847_v28 = vmul.f32 %v6851_v13, %v2751_v47  ;;  %v2749_v3 = vadd.f32 %v2710_v58, %v2558_v25  ;;  %v2956_v29 = vmax.f32 %v2940_v49, 0.0  ;;  %v6864_v18 = vld [vmem:[#allocation18_spill] sm:$0xff]  ;;  %v6867_v58 = vld [vmem:[#allocation7_spill] sm:$0xff] }
 0x2e1   :  { %v4928_v8 = vpop.f32.mrf.mxu1  ;;  %v2372_v46 = vadd.f32 %v6862_v60, %v2181_v27  ;;  %v2565_v25 = vadd.f32 %v4912_v56, %v2374_v50  ;;  %v122_v61 = vld [vmem:[%s6794_s8 + $0x140] sm:$0xff]  ;;  %v123_v15 = vld [vmem:[%s6794_s8 + $0x148] sm:$0xff] }
 0x2e2   :  { %v2954_v38 = vmax.f32 %v2938_v19, 0.0  ;;  %v2752_v11 = vadd.f32 %v4928_v8, %v2561_v9  ;;  %v2968_v44 = vpack.c.bf16 %v2956_v29, %v2955_v22  ;;  %v2845_v63 = vmul.f32 %v6856_v5, %v2749_v3  ;;  %v6868_v3 = vld [vmem:[#allocation5_spill] sm:$0xff]  ;;  %v107_v60 = vld [vmem:[%s6794_s8 + $0xc8] sm:$0xff] }
 0x2e3   :  { %v2713_v16 = vpop.f32.mrf.mxu1  ;;  %v2943_v62 = vadd.f32 %v6857_v34, %v2847_v28  ;;  %v2563_v14 = vadd.f32 %v2538_v42, %v2372_v46  ;;  %v6870_v29 = vld [vmem:[#allocation9_spill] sm:$0xff]  ;;  %v131_v34 = vld [vmem:[%s6794_s8 + $0x188] sm:$0xff] }
 0x2e4   :  { %v2967_v51 = vpack.c.bf16 %v2954_v38, %v2953_v21  ;;  %v2848_v53 = vmul.f32 %v6858_v10, %v2752_v11  ;;  %v2750_v17 = vadd.f32 %v2713_v16, %v2559_v59  ;;  %v2941_v55 = vadd.f32 %v6863_v2, %v2845_v63  ;;  %v6872_v21 = vld [vmem:[#allocation8_spill] sm:$0xff]  ;;  %v82_v2 = vld [vmem:[%s6794_s8] sm:$0xff] }
 0x2e5   :  { %v4931_v37 = vpop.f32.mrf.mxu1  ;;  %v2959_v43 = vmax.f32 %v2943_v62, 0.0  ;;  %v139_v62 = vld [vmem:[%s6794_s8 + $0x1c8] sm:$0xff] }
 0x2e6   :  { %v2944_v20 = vadd.f32 %v6861_v23, %v2848_v53  ;;  %v2755_v32 = vadd.f32 %v4931_v37, %v2564_v48  ;;  %v2846_v47 = vmul.f32 %v6864_v18, %v2750_v17  ;;  %v2957_v19 = vmax.f32 %v2941_v55, 0.0  ;;  %v106_v23 = vld [vmem:[%s6794_s8 + $0xc0] sm:$0xff]  ;;  %v83_v18 = vld [vmem:[%s6794_s8 + $0x8] sm:$0xff] }
 0x2e7   :  { %v2726_v35 = vpop.f32.mrf.mxu1  ;;  %v6874_v48 = vmov 0.0   ;;  %v6294_v10 = vcombine.high %v131_v34, %v139_v62  ;;  %v6875_v53 = vmov 0   ;;  %v90_v55 = vld [vmem:[%s6794_s8 + $0x40] sm:$0xff] }
 0x2e8   :  { %v2960_v57 = vmax.f32 %v2944_v20, 0.0  ;;  %v2851_v24 = vmul.f32 %v6865_v33, %v2755_v32  ;;  %v2753_v4 = vadd.f32 %v2726_v35, %v2562_v45  ;;  %v2942_v0 = vadd.f32 %v6866_v7, %v2846_v47  ;;  %v98_v45 = vld [vmem:[%s6794_s8 + $0x80] sm:$0xff]  ;;  %v99_v20 = vld [vmem:[%s6794_s8 + $0x88] sm:$0xff]  ;;  %v133_v7 = vld [vmem:[%s6794_s8 + $0x198] sm:$0xff] }
 0x2e9   :  { %v4932_v40 = vpop.f32.mrf.mxu1  ;;  %v6338_v32 = vcombine.high %v98_v45, %v106_v23  ;;  %v6343_v46 = vcombine.low %v98_v45, %v106_v23  ;;  %v6347_v42 = vcombine.high %v99_v20, %v107_v60  ;;  %v6362_v47 = vcombine.high %v82_v2, %v90_v55  ;;  %v91_v35 = vld [vmem:[%s6794_s8 + $0x48] sm:$0xff] }
 0x2ea   :  { %v2970_v49 = vpack.c.bf16 %v2960_v57, %v2959_v43  ;;  %v2849_v9 = vmul.f32 %v6867_v58, %v2753_v4  ;;  %v2756_v36 = vadd.f32 %v4932_v40, %v2565_v25  ;;  %v2958_v13 = vmax.f32 %v2942_v0, 0.0  ;;  %v140_v4 = vld [vmem:[%s6794_s8 + $0x1d0] sm:$0xff] }
 0x2eb   :  { %v2729_v28 = vpop.f32.mrf.mxu1  ;;  %v2947_v30 = vadd.f32 %v6868_v3, %v2851_v24  ;;  %v6345_v25 = vcombine.low %v99_v20, %v107_v60  ;;  %v6367_v43 = vcombine.low %v82_v2, %v90_v55  ;;  %v6369_v57 = vcombine.low %v83_v18, %v91_v35  ;;  %v132_v24 = vld [vmem:[%s6794_s8 + $0x190] sm:$0xff]  ;;  %v134_v2 = vld [vmem:[%s6794_s8 + $0x1a0] sm:$0xff] }
 0x2ec   :  { %v2852_v31 = vmul.f32 %v6869_v41, %v2756_v36  ;;  %v2754_v54 = vadd.f32 %v2729_v28, %v2563_v14  ;;  %v2969_v22 = vpack.c.bf16 %v2958_v13, %v2957_v19  ;;  %v2945_v8 = vadd.f32 %v6870_v29, %v2849_v9  ;;  %v141_v14 = vld [vmem:[%s6794_s8 + $0x1d8] sm:$0xff]  ;;  %v3023_v9 = vpop.permute.xlu1 %3022  ;;  %v3028_v36 = vpop.permute.xlu0 %3027  ;;  %v142_v55 = vld [vmem:[%s6794_s8 + $0x1e0] sm:$0xff] }
 0x2ed   :  { %v2963_v11 = vmax.f32 %v2947_v30, 0.0  ;;  %v6371_v33 = vcombine.high %v83_v18, %v91_v35  ;;  %v6386_v0 = vcombine.low %v132_v24, %v140_v4  ;;  %v6388_v40 = vcombine.high %v132_v24, %v140_v4  ;;  %v135_v18 = vld [vmem:[%s6794_s8 + $0x1a8] sm:$0xff] }
 0x2ee   :  { %v2948_v6 = vadd.f32 %v6871_v1, %v2852_v31  ;;  %v2850_v38 = vmul.f32 %v6872_v21, %v2754_v54  ;;  %v2961_v56 = vmax.f32 %v2945_v8, 0.0  ;;  %v6395_v58 = vcombine.high %v133_v7, %v141_v14  ;;  %v116_v8 = vld [vmem:[%s6794_s8 + $0x110] sm:$0xff]  ;;  %v143_v35 = vld [vmem:[%s6794_s8 + $0x1e8] sm:$0xff] }
 0x2ef   :  { %v124_v1 = vld [vmem:[%s6794_s8 + $0x150] sm:$0xff] }
 0x2f0   :  { %v2964_v12 = vmax.f32 %v2948_v6, 0.0  ;;  %v2946_v59 = vadd.f32 %v6873_v52, %v2850_v38  ;;  %v3035_v3 = vpop.permute.xlu1 %3034  ;;  %v3040_v54 = vpop.permute.xlu0 %3039  ;;  %v117_v38 = vld [vmem:[%s6794_s8 + $0x118] sm:$0xff]  ;;  %v6413_v52 = vcombine.high %v116_v8, %v124_v1 }
 0x2f2   :  { %v2972_v5 = vpack.c.bf16 %v2964_v12, %v2963_v11  ;;  %v2962_v63 = vmax.f32 %v2946_v59, 0.0  ;;  %v125_v11 = vld [vmem:[%s6794_s8 + $0x158] sm:$0xff] }
 0x2f3   :  { %v6415_v59 = vcombine.high %v117_v38, %v125_v11 }
 0x2f4   :  { %v2971_v16 = vpack.c.bf16 %v2962_v63, %v2961_v56  ;;  %4934 = vmatpush3.bf16.msra.mxu0 %v2972_v5  ;;  %v100_v56 = vld [vmem:[%s6794_s8 + $0x90] sm:$0xff]  ;;  %v101_v63 = vld [vmem:[%s6794_s8 + $0x98] sm:$0xff] }
 0x2f5   :  { %4935 = vmatprep.subr.bf16.mxu0 %v6874_v48  ;;  %v108_v5 = vld [vmem:[%s6794_s8 + $0xd0] sm:$0xff] }
 0x2f6   :  { %v6462_v45 = vcombine.low %v100_v56, %v108_v5 }
 0x2f8   :  { %4936 = vmatpush3.bf16.msra.mxu0 %v2971_v16  ;;  %v109_v16 = vld [vmem:[%s6794_s8 + $0xd8] sm:$0xff] }
 0x2f9   :  { %4937 = vmatprep.subr.bf16.mxu0 %v6874_v48  ;;  %v6466_v23 = vcombine.low %v101_v63, %v109_v16 }
 0x2fc   :  { %4938 = vmatpush3.bf16.msra.mxu0 %v2970_v49  ;;  %v6393_v49 = vcombine.low %v133_v7, %v141_v14  ;;  %v6492_v7 = vcombine.high %v134_v2, %v142_v55  ;;  %v6495_v14 = vcombine.high %v135_v18, %v143_v35 }
 0x2fd   :  { %4939 = vmatprep.subr.bf16.mxu0 %v6874_v48 }
 0x300   :  { %4940 = vmatpush3.bf16.msra.mxu0 %v2969_v22 }
 0x301   :  { %4941 = vmatprep.subr.bf16.mxu0 %v6874_v48 }
 0x304   :  { %4942 = vmatpush3.bf16.msra.mxu0 %v2968_v44  ;;  %v5159_v44 = vld [vmem:[%s6793_s5] sm:$0xff]  }
 0x305   :  { %4943 = vmatprep.subr.bf16.mxu0 %v6874_v48 }
 0x308   :  { %4944 = vmatpush3.bf16.msra.mxu0 %v2967_v51  ;;  %v6300_v51 = vcombine.low %v131_v34, %v139_v62  ;;  %v6440_v34 = vcombine.low %v117_v38, %v125_v11  ;;  %v6442_v62 = vcombine.high %v100_v56, %v108_v5  ;;  %v86_v38 = vld [vmem:[%s6794_s8 + $0x20] sm:$0xff]  ;;  %v87_v56 = vld [vmem:[%s6794_s8 + $0x28] sm:$0xff] }
 0x309   :  { %4945 = vmatprep.subr.bf16.mxu0 %v6874_v48  ;;  %v94_v11 = vld [vmem:[%s6794_s8 + $0x60] sm:$0xff]  ;;  %v95_v5 = vld [vmem:[%s6794_s8 + $0x68] sm:$0xff] }
 0x30c   :  { %4946 = vmatpush3.bf16.msra.mxu0 %v6235_v26  ;;  %v114_v26 = vld [vmem:[%s6794_s8 + $0x100] sm:$0xff] }
 0x30d   :  { %4947 = vmatprep.subr.bf16.mxu0 %v6874_v48  ;;  %v6314_v27 = vcombine.high %v114_v26, %v122_v61  ;;  %v6319_v50 = vcombine.low %v114_v26, %v122_v61  ;;  %v6436_v48 = vcombine.low %v116_v8, %v124_v1  ;;  %v84_v26 = vld [vmem:[%s6794_s8 + $0x10] sm:$0xff] }
 0x30e   :  { %v92_v61 = vld [vmem:[%s6794_s8 + $0x50] sm:$0xff] }
 0x30f   :  { %3380 = vmatprep.subr.bf16.mxu1 %v6314_v27  ;;  %v6468_v20 = vcombine.high %v84_v26, %v92_v61  ;;  %v6486_v24 = vcombine.low %v84_v26, %v92_v61  ;;  %v6570_v26 = vcombine.high %v86_v38, %v94_v11  ;;  %v6573_v61 = vcombine.high %v87_v56, %v95_v5 }
 0x310   :  { %4948 = vmatpush3.bf16.msra.mxu0 %v6244_v39  ;;  %v115_v39 = vld [vmem:[%s6794_s8 + $0x108] sm:$0xff]  ;;  %3381 = vmatpush1.bf16.msra.mxu1 %v6319_v50 }
 0x311   :  { %3419 = vmatprep.subr.bf16.mxu0 %v6294_v10  ;;  %v6321_v17 = vcombine.low %v115_v39, %v123_v15  ;;  %v6323_v37 = vcombine.high %v115_v39, %v123_v15  ;;  %3382 = vmatprep.subr.bf16.mxu1 %v6338_v32  ;;  %v85_v39 = vld [vmem:[%s6794_s8 + $0x18] sm:$0xff] }
 0x312   :  { %v93_v15 = vld [vmem:[%s6794_s8 + $0x58] sm:$0xff] }
 0x313   :  { %4950 = vmatmul.mubr.bf16.vlgmr.msra.gmra.mxu0 %v5159_v44  ;;  %v6445_v44 = vcombine.high %v101_v63, %v109_v16  ;;  %v6471_v60 = vcombine.high %v85_v39, %v93_v15  ;;  %v6490_v4 = vcombine.low %v85_v39, %v93_v15  ;;  %v136_v39 = vld [vmem:[%s6794_s8 + $0x1b0] sm:$0xff] }
 0x314   :  { %3420 = vmatpush1.bf16.msra.mxu0 %v6300_v51  ;;  %3443 = vmatprep.mubr.bf16.mxu0 %v6875_v53  ;;  %v144_v15 = vld [vmem:[%s6794_s8 + $0x1f0] sm:$0xff] }
 0x315   :  { %3421 = vmatprep.subr.bf16.mxu0 %v6323_v37  ;;  %3383 = vmatpush1.bf16.msra.mxu1 %v6343_v46 }
 0x316   :  { %3384 = vmatprep.subr.bf16.mxu1 %v6362_v47 }
 0x318   :  { %3422 = vmatpush1.bf16.msra.mxu0 %v6321_v17 }
 0x319   :  { %3423 = vmatprep.subr.bf16.mxu0 %v6347_v42  ;;  %3385 = vmatpush1.bf16.msra.mxu1 %v6367_v43 }
 0x31a   :  { %3460 = vmatprep.subr.bf16.mxu1 %v6388_v40 }
 0x31c   :  { %3424 = vmatpush1.bf16.msra.mxu0 %v6345_v25 }
 0x31d   :  { %3425 = vmatprep.subr.bf16.mxu0 %v6371_v33 }
 0x320   :  { %3426 = vmatpush1.bf16.msra.mxu0 %v6369_v57 }
 0x321   :  { %3501 = vmatprep.subr.bf16.mxu0 %v6395_v58 }
 0x3d3   :  { %v3013_v19 = vpop.f32.mrf.mxu0 }
 0x3d4   :  { %v3030_v13 = vmul.f32 %v3023_v9, %v3013_v19  ;;  %v118_v9 = vld [vmem:[%s6794_s8 + $0x120] sm:$0xff]  ;;  %v119_v19 = vld [vmem:[%s6794_s8 + $0x128] sm:$0xff] }
 0x3d5   :  { %v4951_v28 = vpop.f32.mrf.mxu0 }
 0x3d6   :  { %v3042_v41 = vadd.f32 %v3035_v3, %v3030_v13  ;;  %v127_v13 = vld [vmem:[%s6794_s8 + $0x168] sm:$0xff]  ;;  %v6510_v28 = vcombine.low %v134_v2, %v142_v55  ;;  %v6514_v3 = vcombine.low %v135_v18, %v143_v35  ;;  %v137_v2 = vld [vmem:[%s6794_s8 + $0x1b8] sm:$0xff]  ;;  %v6588_v18 = vcombine.low %v86_v38, %v94_v11 }
 0x3d7   :  { %v3016_v30 = vpop.f32.mrf.mxu0  ;;  %v6542_v1 = vcombine.low %v119_v19, %v127_v13  ;;  %v145_v55 = vld [vmem:[%s6794_s8 + $0x1f8] sm:$0xff]  ;;  %v6592_v35 = vcombine.low %v87_v56, %v95_v5  ;;  %v104_v56 = vld [vmem:[%s6794_s8 + $0xb0] sm:$0xff] }
 0x3d8   :  { %v3031_v31 = vmul.f32 %v3028_v36, %v3016_v30  ;;  %v3044_v6 = vmax.f32 %v3042_v41, 0.0  ;;  %v126_v36 = vld [vmem:[%s6794_s8 + $0x160] sm:$0xff]  ;;  %v6519_v41 = vcombine.high %v119_v19, %v127_v13  ;;  %v120_v19 = vld [vmem:[%s6794_s8 + $0x130] sm:$0xff] }
 0x3d9   :  { %v4952_v22 = vpop.f32.mrf.mxu0  ;;  %v6516_v30 = vcombine.high %v118_v9, %v126_v36  ;;  %v6538_v8 = vcombine.low %v118_v9, %v126_v36  ;;  %6876 = vst [vmem:[#allocation27_spill] sm:$0xff] %v6592_v35  ;;  %v6594_v9 = vcombine.high %v136_v39, %v144_v15  ;;  %v6597_v36 = vcombine.high %v137_v2, %v145_v55  ;;  %v128_v13 = vld [vmem:[%s6794_s8 + $0x170] sm:$0xff] }
 0x3da   :  { %v3043_v29 = vadd.f32 %v3040_v54, %v3031_v31  ;;  %v102_v31 = vld [vmem:[%s6794_s8 + $0xa0] sm:$0xff]  ;;  %v103_v22 = vld [vmem:[%s6794_s8 + $0xa8] sm:$0xff]  ;;  %v6618_v38 = vcombine.high %v120_v19, %v128_v13  ;;  %v112_v5 = vld [vmem:[%s6794_s8 + $0xf0] sm:$0xff] }
 0x3db   :  { %v110_v54 = vld [vmem:[%s6794_s8 + $0xe0] sm:$0xff]  ;;  %6877 = vst [vmem:[#allocation19_spill] sm:$0xff] %v6594_v9  ;;  %6878 = vst [vmem:[#allocation22_spill] sm:$0xff] %v6597_v36 }
 0x3dc   :  { %v3045_v21 = vmax.f32 %v3043_v29, 0.0  ;;  %v111_v29 = vld [vmem:[%s6794_s8 + $0xe8] sm:$0xff]  ;;  %v6564_v63 = vcombine.low %v102_v31, %v110_v54  ;;  %6881 = vst [vmem:[#allocation23_spill] sm:$0xff] %v6618_v38 }
 0x3dd   :  { %v6568_v16 = vcombine.low %v103_v22, %v111_v29 }
 0x3de   :  { %v6411_v12 = vpack.c.bf16 %v3045_v21, %v3044_v6  ;;  %v6544_v6 = vcombine.high %v102_v31, %v110_v54  ;;  %v6547_v21 = vcombine.high %v103_v22, %v111_v29  ;;  %v121_v31 = vld [vmem:[%s6794_s8 + $0x138] sm:$0xff]  ;;  %v6612_v22 = vcombine.low %v136_v39, %v144_v15 }
 0x3df   :  { %v129_v54 = vld [vmem:[%s6794_s8 + $0x178] sm:$0xff]  ;;  %v6616_v29 = vcombine.low %v137_v2, %v145_v55  ;;  %v6640_v2 = vcombine.low %v120_v19, %v128_v13  ;;  %v96_v19 = vld [vmem:[%s6794_s8 + $0x70] sm:$0xff] }
 0x3e0   :  { %3758 = vrot.lane.b32.xlu1 %v6411_v12, %s5160_s15  ;;  %4596 = vmatmul.mubr.msk.bf16.vlgmr.msra.gmra.mxu1 %vm1074_vm1, %v6411_v12  ;;  %6879 = vst [vmem:[#allocation24_spill] sm:$0xff] %v6612_v22  ;;  %v6621_v11 = vcombine.high %v121_v31, %v129_v54  ;;  %v105_v39 = vld [vmem:[%s6794_s8 + $0xb8] sm:$0xff]  ;;  %v6644_v55 = vcombine.low %v121_v31, %v129_v54 }
 0x3e1   :  { %4597 = vmatmul.mubr.msk.bf16.vlgmr.msra.gmra.mxu0 %vm1074_vm1, %v6411_v12  ;;  %3461 = vmatpush1.bf16.msra.mxu1 %v6386_v0  ;;  %6880 = vst [vmem:[#allocation25_spill] sm:$0xff] %v6616_v29  ;;  %v113_v15 = vld [vmem:[%s6794_s8 + $0xf8] sm:$0xff]  ;;  %v6666_v54 = vcombine.low %v104_v56, %v112_v5 }
 0x3e2   :  { %3502 = vmatpush1.bf16.msra.mxu0 %v6393_v49  ;;  %3462 = vmatprep.subr.bf16.mxu1 %v6413_v52  ;;  %6882 = vst [vmem:[#allocation29_spill] sm:$0xff] %v6621_v11  ;;  %v89_v13 = vld [vmem:[%s6794_s8 + $0x38] sm:$0xff] }
 0x3e3   :  { %3503 = vmatprep.subr.bf16.mxu0 %v6415_v59  ;;  %3484 = vmatprep.mubr.bf16.mxu1 %v6875_v53  ;;  %v97_v31 = vld [vmem:[%s6794_s8 + $0x78] sm:$0xff] }
 0x3e4   :  { %3525 = vmatprep.mubr.bf16.mxu0 %v6875_v53 }
 0x3e5   :  { %3463 = vmatpush1.bf16.msra.mxu1 %v6436_v48 }
 0x3e6   :  { %3504 = vmatpush1.bf16.msra.mxu0 %v6440_v34  ;;  %3464 = vmatprep.subr.bf16.mxu1 %v6442_v62 }
 0x3e7   :  { %3505 = vmatprep.subr.bf16.mxu0 %v6445_v44 }
 0x3e9   :  { %3465 = vmatpush1.bf16.msra.mxu1 %v6462_v45 }
 0x3ea   :  { %3506 = vmatpush1.bf16.msra.mxu0 %v6466_v23  ;;  %3466 = vmatprep.subr.bf16.mxu1 %v6468_v20 }
 0x3eb   :  { %3507 = vmatprep.subr.bf16.mxu0 %v6471_v60 }
 0x3ed   :  { %3467 = vmatpush1.bf16.msra.mxu1 %v6486_v24 }
 0x3ee   :  { %3508 = vmatpush1.bf16.msra.mxu0 %v6490_v4  ;;  %3542 = vmatprep.subr.bf16.mxu1 %v6492_v7 }
 0x3ef   :  { %3583 = vmatprep.subr.bf16.mxu0 %v6495_v14 }
 0x3f0   :  { %4598 = vmatmul.mubr.msk.bf16.vlgmr.msra.gmra.mxu1 %vm1074_vm1, %v6411_v12 }
 0x3f1   :  { %4599 = vmatmul.mubr.msk.bf16.vlgmr.msra.gmra.mxu0 %vm1074_vm1, %v6411_v12  ;;  %3543 = vmatpush1.bf16.msra.mxu1 %v6510_v28 }
 0x3f2   :  { %3584 = vmatpush1.bf16.msra.mxu0 %v6514_v3  ;;  %3544 = vmatprep.subr.bf16.mxu1 %v6516_v30 }
 0x3f3   :  { %3585 = vmatprep.subr.bf16.mxu0 %v6519_v41  ;;  %3566 = vmatprep.mubr.bf16.mxu1 %v6875_v53 }
 0x3f4   :  { %3607 = vmatprep.mubr.bf16.mxu0 %v6875_v53 }
 0x3f5   :  { %3545 = vmatpush1.bf16.msra.mxu1 %v6538_v8 }
 0x3f6   :  { %3586 = vmatpush1.bf16.msra.mxu0 %v6542_v1  ;;  %3546 = vmatprep.subr.bf16.mxu1 %v6544_v6 }
 0x3f7   :  { %3587 = vmatprep.subr.bf16.mxu0 %v6547_v21 }
 0x3f9   :  { %3547 = vmatpush1.bf16.msra.mxu1 %v6564_v63 }
 0x3fa   :  { %3588 = vmatpush1.bf16.msra.mxu0 %v6568_v16  ;;  %3548 = vmatprep.subr.bf16.mxu1 %v6570_v26 }
 0x3fb   :  { %3589 = vmatprep.subr.bf16.mxu0 %v6573_v61 }
 0x3fd   :  { %3549 = vmatpush1.bf16.msra.mxu1 %v6588_v18 }
 0x3fe   :  { %3590 = vmatpush1.bf16.msra.mxu0 %v6592_v35  ;;  %3624 = vmatprep.subr.bf16.mxu1 %v6594_v9  ;;  %v6649_v9 = vcombine.high %v105_v39, %v113_v15  ;;  %v88_v35 = vld [vmem:[%s6794_s8 + $0x30] sm:$0xff] }
 0x3ff   :  { %3665 = vmatprep.subr.bf16.mxu0 %v6597_v36  ;;  %v6646_v36 = vcombine.high %v104_v56, %v112_v5  ;;  %v6682_v56 = vcombine.low %v89_v13, %v97_v31  ;;  %v6883_v5 = vld [vmem:[#allocation13_spill] sm:$0xff] }
 0x400   :  { %4600 = vmatmul.mubr.msk.bf16.vlgmr.msra.gmra.mxu1 %vm1074_vm1, %v6411_v12 }
 0x401   :  { %4601 = vmatmul.mubr.msk.bf16.vlgmr.msra.gmra.mxu0 %vm1074_vm1, %v6411_v12  ;;  %3625 = vmatpush1.bf16.msra.mxu1 %v6612_v22  ;;  %v6678_v22 = vcombine.low %v88_v35, %v96_v19 }
 0x402   :  { %3666 = vmatpush1.bf16.msra.mxu0 %v6616_v29  ;;  %3626 = vmatprep.subr.bf16.mxu1 %v6618_v38  ;;  %v6672_v38 = vcombine.high %v88_v35, %v96_v19  ;;  %v6675_v29 = vcombine.high %v89_v13, %v97_v31  ;;  %v6884_v35 = vld [vmem:[#allocation12_spill] sm:$0xff] }
 0x403   :  { %3667 = vmatprep.subr.bf16.mxu0 %v6621_v11  ;;  %3648 = vmatprep.mubr.bf16.mxu1 %v6875_v53  ;;  %v6670_v11 = vcombine.low %v105_v39, %v113_v15 }
 0x404   :  { %3689 = vmatprep.mubr.bf16.mxu0 %v6875_v53 }
 0x405   :  { %3627 = vmatpush1.bf16.msra.mxu1 %v6640_v2 }
 0x406   :  { %3668 = vmatpush1.bf16.msra.mxu0 %v6644_v55  ;;  %3628 = vmatprep.subr.bf16.mxu1 %v6646_v36 }
 0x407   :  { %3669 = vmatprep.subr.bf16.mxu0 %v6649_v9 }
 0x409   :  { %3629 = vmatpush1.bf16.msra.mxu1 %v6666_v54 }
 0x40a   :  { %3670 = vmatpush1.bf16.msra.mxu0 %v6670_v11  ;;  %3630 = vmatprep.subr.bf16.mxu1 %v6672_v38 }
 0x40b   :  { %3671 = vmatprep.subr.bf16.mxu0 %v6675_v29 }
 0x40d   :  { %3631 = vmatpush1.bf16.msra.mxu1 %v6678_v22 }
 0x40e   :  { %3672 = vmatpush1.bf16.msra.mxu0 %v6682_v56  ;;  %3771 = vmatprep.subr.bf16.mxu1 %v6883_v5 }
 0x40f   :  { %3812 = vmatprep.subr.bf16.mxu0 %v6294_v10 }
 0x410   :  { %4602 = vmatmul.mubr.msk.bf16.vlgmr.msra.gmra.mxu1 %vm1074_vm1, %v6411_v12 }
 0x411   :  { %4603 = vmatmul.mubr.msk.bf16.vlgmr.msra.gmra.mxu0 %vm1074_vm1, %v6411_v12  ;;  %3772 = vmatpush1.bf16.msra.mxu1 %v6884_v35 }
 0x412   :  { %3813 = vmatpush1.bf16.msra.mxu0 %v6300_v51  ;;  %3773 = vmatprep.subr.bf16.mxu1 %v6314_v27  ;;  %v6885_v51 = vld [vmem:[#allocation27_spill] sm:$0xff] }
 0x413   :  { %3814 = vmatprep.subr.bf16.mxu0 %v6323_v37  ;;  %3795 = vmatprep.mubr.bf16.mxu1 %v6875_v53  ;;  %v6886_v27 = vld [vmem:[#allocation19_spill] sm:$0xff]  ;;  %v6889_v37 = vld [vmem:[#allocation25_spill] sm:$0xff] }
 0x414   :  { %3836 = vmatprep.mubr.bf16.mxu0 %v6875_v53 }
 0x415   :  { %3774 = vmatpush1.bf16.msra.mxu1 %v6319_v50  ;;  %v6887_v50 = vld [vmem:[#allocation22_spill] sm:$0xff] }
 0x416   :  { %3815 = vmatpush1.bf16.msra.mxu0 %v6321_v17  ;;  %3775 = vmatprep.subr.bf16.mxu1 %v6338_v32  ;;  %v6888_v17 = vld [vmem:[#allocation24_spill] sm:$0xff]  ;;  %v6890_v32 = vld [vmem:[#allocation23_spill] sm:$0xff] }
 0x417   :  { %3816 = vmatprep.subr.bf16.mxu0 %v6347_v42 }
 0x419   :  { %3776 = vmatpush1.bf16.msra.mxu1 %v6343_v46  ;;  %v6891_v46 = vld [vmem:[#allocation29_spill] sm:$0xff] }
 0x41a   :  { %3817 = vmatpush1.bf16.msra.mxu0 %v6345_v25  ;;  %3777 = vmatprep.subr.bf16.mxu1 %v6362_v47 }
 0x41b   :  { %3818 = vmatprep.subr.bf16.mxu0 %v6371_v33 }
 0x41d   :  { %3778 = vmatpush1.bf16.msra.mxu1 %v6367_v43 }
 0x41e   :  { %3819 = vmatpush1.bf16.msra.mxu0 %v6369_v57  ;;  %3853 = vmatprep.subr.bf16.mxu1 %v6388_v40 }
 0x41f   :  { %3894 = vmatprep.subr.bf16.mxu0 %v6395_v58 }
 0x452   :  { %v3759_v10 = vpop.permute.xlu1 %3758 }
 0x453   :  { %4604 = vmatmul.mubr.msk.bf16.vlgmr.msra.gmra.mxu1 %vm1074_vm1, %v3759_v10  ;;  %4605 = vmatmul.mubr.msk.bf16.vlgmr.msra.gmra.mxu0 %vm1074_vm1, %v3759_v10 }
 0x454   :  { %3854 = vmatpush1.bf16.msra.mxu1 %v6386_v0  ;;  %3895 = vmatpush1.bf16.msra.mxu0 %v6393_v49 }
 0x455   :  { %3855 = vmatprep.subr.bf16.mxu1 %v6413_v52  ;;  %3896 = vmatprep.subr.bf16.mxu0 %v6415_v59 }
 0x456   :  { %3877 = vmatprep.mubr.bf16.mxu1 %v6875_v53  ;;  %3918 = vmatprep.mubr.bf16.mxu0 %v6875_v53 }
 0x458   :  { %3856 = vmatpush1.bf16.msra.mxu1 %v6436_v48  ;;  %3897 = vmatpush1.bf16.msra.mxu0 %v6440_v34 }
 0x459   :  { %3857 = vmatprep.subr.bf16.mxu1 %v6442_v62  ;;  %3898 = vmatprep.subr.bf16.mxu0 %v6445_v44 }
 0x45c   :  { %3858 = vmatpush1.bf16.msra.mxu1 %v6462_v45  ;;  %3899 = vmatpush1.bf16.msra.mxu0 %v6466_v23 }
 0x45d   :  { %3859 = vmatprep.subr.bf16.mxu1 %v6468_v20  ;;  %3900 = vmatprep.subr.bf16.mxu0 %v6471_v60 }
 0x460   :  { %3860 = vmatpush1.bf16.msra.mxu1 %v6486_v24  ;;  %3901 = vmatpush1.bf16.msra.mxu0 %v6490_v4 }
 0x461   :  { %3935 = vmatprep.subr.bf16.mxu1 %v6492_v7  ;;  %3976 = vmatprep.subr.bf16.mxu0 %v6495_v14 }
 0x463   :  { %4606 = vmatmul.mubr.msk.bf16.vlgmr.msra.gmra.mxu1 %vm1074_vm1, %v3759_v10  ;;  %4607 = vmatmul.mubr.msk.bf16.vlgmr.msra.gmra.mxu0 %vm1074_vm1, %v3759_v10 }
 0x464   :  { %3936 = vmatpush1.bf16.msra.mxu1 %v6510_v28  ;;  %3977 = vmatpush1.bf16.msra.mxu0 %v6514_v3 }
 0x465   :  { %3937 = vmatprep.subr.bf16.mxu1 %v6516_v30  ;;  %3978 = vmatprep.subr.bf16.mxu0 %v6519_v41 }
 0x466   :  { %3959 = vmatprep.mubr.bf16.mxu1 %v6875_v53  ;;  %4000 = vmatprep.mubr.bf16.mxu0 %v6875_v53 }
 0x468   :  { %3938 = vmatpush1.bf16.msra.mxu1 %v6538_v8  ;;  %3979 = vmatpush1.bf16.msra.mxu0 %v6542_v1 }
 0x469   :  { %3939 = vmatprep.subr.bf16.mxu1 %v6544_v6  ;;  %3980 = vmatprep.subr.bf16.mxu0 %v6547_v21 }
 0x46c   :  { %3940 = vmatpush1.bf16.msra.mxu1 %v6564_v63  ;;  %3981 = vmatpush1.bf16.msra.mxu0 %v6568_v16 }
 0x46d   :  { %3941 = vmatprep.subr.bf16.mxu1 %v6570_v26  ;;  %3982 = vmatprep.subr.bf16.mxu0 %v6573_v61 }
 0x470   :  { %3942 = vmatpush1.bf16.msra.mxu1 %v6588_v18  ;;  %3983 = vmatpush1.bf16.msra.mxu0 %v6885_v51 }
 0x471   :  { %4017 = vmatprep.subr.bf16.mxu1 %v6886_v27  ;;  %4058 = vmatprep.subr.bf16.mxu0 %v6887_v50 }
 0x473   :  { %4608 = vmatmul.mubr.msk.bf16.vlgmr.msra.gmra.mxu1 %vm1074_vm1, %v3759_v10  ;;  %4609 = vmatmul.mubr.msk.bf16.vlgmr.msra.gmra.mxu0 %vm1074_vm1, %v3759_v10 }
 0x474   :  { %4018 = vmatpush1.bf16.msra.mxu1 %v6888_v17  ;;  %4059 = vmatpush1.bf16.msra.mxu0 %v6889_v37  ;;  %v17_v17 = vstv %s6795_s11 }
 0x475   :  { %4019 = vmatprep.subr.bf16.mxu1 %v6890_v32  ;;  %4060 = vmatprep.subr.bf16.mxu0 %v6891_v46  ;;  %18 = vst [vmem:[#allocation2] sm:$0x1] %v17_v17 }
 0x476   :  { %4041 = vmatprep.mubr.bf16.mxu1 %v6875_v53  ;;  %4082 = vmatprep.mubr.bf16.mxu0 %v6875_v53 }
 0x478   :  { %4020 = vmatpush1.bf16.msra.mxu1 %v6640_v2  ;;  %4061 = vmatpush1.bf16.msra.mxu0 %v6644_v55 }
 0x479   :  { %4021 = vmatprep.subr.bf16.mxu1 %v6646_v36  ;;  %4062 = vmatprep.subr.bf16.mxu0 %v6649_v9 }
 0x47c   :  { %4022 = vmatpush1.bf16.msra.mxu1 %v6666_v54  ;;  %4063 = vmatpush1.bf16.msra.mxu0 %v6670_v11 }
 0x47d   :  { %4023 = vmatprep.subr.bf16.mxu1 %v6672_v38  ;;  %4064 = vmatprep.subr.bf16.mxu0 %v6675_v29 }
 0x480   :  { %4024 = vmatpush1.bf16.msra.mxu1 %v6678_v22  ;;  %4065 = vmatpush1.bf16.msra.mxu0 %v6682_v56 }
 0x483   :  { %4610 = vmatmul.mubr.msk.bf16.vlgmr.msra.gmra.mxu1 %vm1074_vm1, %v3759_v10  ;;  %4611 = vmatmul.mubr.msk.bf16.vlgmr.msra.gmra.mxu0 %vm1074_vm1, %v3759_v10 }
 0x4a0   :  { %v3404_v53 = vpop.f32.mrf.mxu1 }
 0x4a1   :  { %v3445_v25 = vpop.f32.mrf.mxu0 }
 0x4a2   :  { %v3406_v42 = vpop.f32.mrf.mxu1 }
 0x4a3   :  { %v3699_v47 = vrot.slane %v3406_v42, 1  ;;  %v3447_v43 = vpop.f32.mrf.mxu0 }
 0x4a4   :  { %v3703_v57 = vrot.slane %v3447_v43, 1  ;;  %v3408_v33 = vpop.f32.mrf.mxu1 }
 0x4a5   :  { %v3701_v0 = vadd.f32 %v3699_v47, %v3404_v53  ;;  %v3449_v40 = vpop.f32.mrf.mxu0 }
 0x4a6   :  { %v3705_v49 = vadd.f32 %v3703_v57, %v3445_v25  ;;  %v3409_v58 = vpop.f32.mrf.mxu1 }
 0x4a7   :  { %v3450_v12 = vpop.f32.mrf.mxu0 }
 0x4a8   :  { %v3731_v52 = vrot.slane %v3705_v49, 2 }
 0x4aa   :  { %v3733_v59 = vadd.f32 %v3731_v52, %v3701_v0 }
 0x4b0   :  { %v3486_v48 = vpop.f32.mrf.mxu1 }
 0x4b1   :  { %v3527_v34 = vpop.f32.mrf.mxu0 }
 0x4b2   :  { %v3488_v62 = vpop.f32.mrf.mxu1 }
 0x4b3   :  { %v3707_v44 = vrot.slane %v3488_v62, 1  ;;  %v3529_v45 = vpop.f32.mrf.mxu0 }
 0x4b4   :  { %v3711_v23 = vrot.slane %v3529_v45, 1  ;;  %v3490_v20 = vpop.f32.mrf.mxu1 }
 0x4b5   :  { %v3709_v60 = vadd.f32 %v3707_v44, %v3486_v48  ;;  %v3531_v24 = vpop.f32.mrf.mxu0 }
 0x4b6   :  { %v3713_v4 = vadd.f32 %v3711_v23, %v3527_v34  ;;  %v3491_v7 = vpop.f32.mrf.mxu1 }
 0x4b7   :  { %v3532_v14 = vpop.f32.mrf.mxu0 }
 0x4b8   :  { %v3735_v28 = vrot.slane %v3713_v4, 2 }
 0x4ba   :  { %v3737_v3 = vadd.f32 %v3735_v28, %v3709_v60 }
 0x4bc   :  { %v3747_v30 = vrot.slane %v3737_v3, 4 }
 0x4be   :  { %v3749_v41 = vadd.f32 %v3747_v30, %v3733_v59 }
 0x4c0   :  { %v3568_v8 = vpop.f32.mrf.mxu1 }
 0x4c1   :  { %v3609_v1 = vpop.f32.mrf.mxu0 }
 0x4c2   :  { %v3569_v6 = vpop.f32.mrf.mxu1 }
 0x4c3   :  { %v3610_v21 = vpop.f32.mrf.mxu0 }
 0x4c4   :  { %v3570_v63 = vpop.f32.mrf.mxu1 }
 0x4c5   :  { %v3611_v16 = vpop.f32.mrf.mxu0 }
 0x4c6   :  { %v3572_v26 = vpop.f32.mrf.mxu1 }
 0x4c7   :  { %v3715_v61 = vrot.slane %v3572_v26, 1  ;;  %v3613_v18 = vpop.f32.mrf.mxu0 }
 0x4c8   :  { %v3719_v9 = vrot.slane %v3613_v18, 1 }
 0x4c9   :  { %v3717_v36 = vadd.f32 %v3715_v61, %v3570_v63 }
 0x4ca   :  { %v3721_v22 = vadd.f32 %v3719_v9, %v3611_v16 }
 0x4cc   :  { %v3739_v29 = vrot.slane %v3721_v22, 2 }
 0x4ce   :  { %v3741_v38 = vadd.f32 %v3739_v29, %v3717_v36 }
 0x4d0   :  { %v3650_v11 = vpop.f32.mrf.mxu1 }
 0x4d1   :  { %v3691_v39 = vpop.f32.mrf.mxu0 }
 0x4d2   :  { %v3651_v15 = vpop.f32.mrf.mxu1 }
 0x4d3   :  { %v3692_v2 = vpop.f32.mrf.mxu0 }
 0x4d4   :  { %v3652_v55 = vpop.f32.mrf.mxu1 }
 0x4d5   :  { %v3693_v19 = vpop.f32.mrf.mxu0 }
 0x4d6   :  { %v3654_v13 = vpop.f32.mrf.mxu1 }
 0x4d7   :  { %v3695_v31 = vpop.f32.mrf.mxu0  ;;  %v3723_v54 = vrot.slane %v3654_v13, 1 }
 0x4d8   :  { %v3727_v56 = vrot.slane %v3695_v31, 1 }
 0x4d9   :  { %v3725_v35 = vadd.f32 %v3723_v54, %v3652_v55 }
 0x4da   :  { %v3729_v5 = vadd.f32 %v3727_v56, %v3693_v19 }
 0x4dc   :  { %v3743_v10 = vrot.slane %v3729_v5, 2 }
 0x4de   :  { %v3745_v51 = vadd.f32 %v3743_v10, %v3725_v35 }
 0x4e0   :  { %v3751_v27 = vrot.slane %v3745_v51, 4 }
 0x4e2   :  { %v3753_v50 = vadd.f32 %v3751_v27, %v3741_v38  ;;  %v146_v27 = vld [vmem:[%s6796_s9] sm:$0x1] }
 0x4e4   :  { %v6774_v37 = vadd.f32 %v3753_v50, %v3749_v41 }
 0x4e6   :  { %v3755_v17 = vadd.f32 %v6774_v37, %v146_v27 }
 0x513   :  { %v3797_v32 = vpop.f32.mrf.mxu1  ;;  %v3838_v46 = vpop.f32.mrf.mxu0 }
 0x515   :  { %v3799_v53 = vpop.f32.mrf.mxu1  ;;  %v3840_v25 = vpop.f32.mrf.mxu0 }
 0x516   :  { %v4096_v28 = vrot.slane %v3840_v25, 1  ;;  %v4092_v22 = vrot.slane %v3799_v53, 1  ;;  %v3756_v25 = vmax.f32 %v3755_v17, 0.0 }
 0x517   :  { %v3801_v42 = vpop.f32.mrf.mxu1  ;;  %v3842_v47 = vpop.f32.mrf.mxu0 }
 0x518   :  { %v4098_v63 = vadd.f32 %v4096_v28, %v3838_v46  ;;  %v4094_v19 = vadd.f32 %v4092_v22, %v3797_v32  ;;  %v4612_v32 = vld [vmem:[%s6797_s10] ss:$0 sm:$0xff] }
 0x519   :  { %v3802_v43 = vpop.f32.mrf.mxu1  ;;  %v3843_v57 = vpop.f32.mrf.mxu0 }
 0x51a   :  { %v4124_v39 = vrot.slane %v4098_v63, 2 }
 0x51c   :  { %v4126_v56 = vadd.f32 %v4124_v39, %v4094_v19 }
 0x523   :  { %v3879_v33 = vpop.f32.mrf.mxu1  ;;  %v3920_v0 = vpop.f32.mrf.mxu0 }
 0x525   :  { %v3881_v40 = vpop.f32.mrf.mxu1  ;;  %v3922_v49 = vpop.f32.mrf.mxu0 }
 0x526   :  { %v4104_v20 = vrot.slane %v3922_v49, 1  ;;  %v4100_v41 = vrot.slane %v3881_v40, 1 }
 0x527   :  { %v3883_v58 = vpop.f32.mrf.mxu1  ;;  %v3924_v12 = vpop.f32.mrf.mxu0 }
 0x528   :  { %v4106_v14 = vadd.f32 %v4104_v20, %v3920_v0  ;;  %v4102_v61 = vadd.f32 %v4100_v41, %v3879_v33  ;;  %v4613_v33 = vld [vmem:[#allocation2] ss:$0 sm:$0xff] }
 0x529   :  { %v3884_v52 = vpop.f32.mrf.mxu1  ;;  %v3925_v59 = vpop.f32.mrf.mxu0 }
 0x52a   :  { %v4128_v21 = vrot.slane %v4106_v14, 2 }
 0x52c   :  { %v4130_v29 = vadd.f32 %v4128_v21, %v4102_v61 }
 0x52e   :  { %v4140_v13 = vrot.slane %v4130_v29, 4 }
 0x530   :  { %v4142_v10 = vadd.f32 %v4140_v13, %v4126_v56 }
 0x533   :  { %v3961_v48 = vpop.f32.mrf.mxu1  ;;  %v4002_v34 = vpop.f32.mrf.mxu0 }
 0x535   :  { %v3962_v62 = vpop.f32.mrf.mxu1  ;;  %v4003_v44 = vpop.f32.mrf.mxu0 }
 0x537   :  { %v3963_v45 = vpop.f32.mrf.mxu1  ;;  %v4004_v23 = vpop.f32.mrf.mxu0 }
 0x539   :  { %v3965_v60 = vpop.f32.mrf.mxu1  ;;  %v4006_v24 = vpop.f32.mrf.mxu0 }
 0x53a   :  { %v4112_v8 = vrot.slane %v4006_v24, 1  ;;  %v4108_v38 = vrot.slane %v3965_v60, 1 }
 0x53c   :  { %v4114_v18 = vadd.f32 %v4112_v8, %v4004_v23  ;;  %v4110_v31 = vadd.f32 %v4108_v38, %v3963_v45 }
 0x53e   :  { %v4132_v15 = vrot.slane %v4114_v18, 2 }
 0x540   :  { %v4134_v5 = vadd.f32 %v4132_v15, %v4110_v31 }
 0x543   :  { %v4043_v4 = vpop.f32.mrf.mxu1  ;;  %v4084_v7 = vpop.f32.mrf.mxu0 }
 0x545   :  { %v4044_v3 = vpop.f32.mrf.mxu1  ;;  %v4085_v30 = vpop.f32.mrf.mxu0 }
 0x547   :  { %v4045_v1 = vpop.f32.mrf.mxu1  ;;  %v4086_v6 = vpop.f32.mrf.mxu0 }
 0x549   :  { %v4047_v16 = vpop.f32.mrf.mxu1  ;;  %v4088_v26 = vpop.f32.mrf.mxu0 }
 0x54a   :  { %v4116_v9 = vrot.slane %v4047_v16, 1  ;;  %v4120_v36 = vrot.slane %v4088_v26, 1 }
 0x54c   :  { %v4122_v11 = vadd.f32 %v4120_v36, %v4086_v6  ;;  %v4118_v2 = vadd.f32 %v4116_v9, %v4045_v1 }
 0x54e   :  { %v4136_v55 = vrot.slane %v4122_v11, 2 }
 0x550   :  { %v4138_v54 = vadd.f32 %v4136_v55, %v4118_v2 }
 0x552   :  { %v4144_v35 = vrot.slane %v4138_v54, 4 }
 0x554   :  { %v4146_v51 = vadd.f32 %v4144_v35, %v4134_v5 }
 0x556   :  { %v4147_v50 = vadd.f32 %v4146_v51, %v4142_v10 }
 0x558   :  { %v4148_v46 = vadd.f32 %v4147_v50, %v146_v27 }
 0x55a   :  { %v4149_v53 = vmax.f32 %v4148_v46, 0.0 }
 0x55c   :  { %v4151_v42 = vrot.slane %v4149_v53, 7 }
 0x55e   :  { %v4154_v47 = vsel %vm4153_vm3, %v3756_v25, %v4151_v42 }
 0x55f   :  { %v4161_v43 = vmul.f32 %v4612_v32, %v4154_v47 }
 0x561   :  { %v4163_v57 = vsel %vm4162_vm4, %v4161_v43, 0.0 }
 0x562   :  { %4164 = vadd.xlane.f32.xlu0 %v4163_v57 }
 0x5eb   :  { %v4165_v0 = vpop.xlane.xlu0 %4164 }
 0x5ec   :  { %v4172_v40 = vadd.f32 %v4613_v33, %v4165_v0 }
 0x5ee   :  { %4174 = vst.msk [vmem:[%s6798_s12] sm:$0x3] %vm4173_vm5, %v4172_v40 }

</bundles_post_ra>
